<compile_context>
chip_gen: v7x
topology: tpu7x:2x2x1
jax: 0.10.0
libtpu: 0.0.40
codegen_flags: <defaults>
</compile_context>

<pallas_src>
import numpy as np

import jax
import jax.numpy as jnp
from jax import lax
from jax.experimental import pallas as pl
from jax.experimental.pallas import tpu as pltpu

KSIZE = 3          # conv kernel size
DIM = 16           # channels ("dim")
RED = 8            # reduction in CA/PA layers
H = W = 16         # spatial size
N = 2              # batch


# ---------------------------------------------------------------------------
# Kernel
# ---------------------------------------------------------------------------
def _make_fablock_kernel(n, h):
    """Kernel factory so n (batch) and h (rows per image) are compile-time."""

    def kernel(x_ref, wb1_ref, b1_ref, wb2_ref, b2_ref,
               wc1_ref, bc1_ref, wc2_ref, bc2_ref,
               wp1_ref, bp1_ref, wp2_ref, bp2_ref,
               out_ref, buf):
        wc = out_ref.shape[1]                       # W * C (lane-dense width)

        # Zero only the n+1 separator/halo rows; the interiors are fully
        # overwritten by every conv3x3 call below.
        zrow = jnp.zeros((1, wc), jnp.float32)
        for i in range(n + 1):
            r = i * (h + 1)
            buf[r:r + 1, :] = zrow

        x = x_ref[...]                              # (N*H, W*C), lane-dense

        def conv3x3(v, wb_ref, b_ref):
            # Stage each image into its interior slot of the halo buffer; the
            # three kh taps are row-shifted views (zero halo rows supply the
            # H-padding, the zero separator rows isolate batch elements), so
            # the whole 3x3 conv over BOTH images is a single
            # (N*H, 3*W*C) x (3*W*C, W*C) MXU matmul (kw shifts + W-padding
            # are baked into the block-banded weight).
            for i in range(n):
                s = 1 + i * (h + 1)
                buf[s:s + h, :] = v[i * h:(i + 1) * h, :]
            parts = []
            for i in range(n):
                s = 1 + i * (h + 1)
                parts.append(jnp.concatenate(
                    [buf[s - 1:s + h - 1, :],        # rows shifted up   (kh=0)
                     v[i * h:(i + 1) * h, :],        # center rows       (kh=1)
                     buf[s + 1:s + h + 1, :]],       # rows shifted down (kh=2)
                    axis=1))
            lhs = jnp.concatenate(parts, axis=0)     # (N*H, 3*W*C)
            return jnp.dot(lhs, wb_ref[...],
                           preferred_element_type=jnp.float32) + b_ref[...]

        # ---- conv1 + ReLU + residual ------------------------------------
        res = jnp.maximum(conv3x3(x, wb1_ref, b1_ref), 0.0) + x
        # ---- conv2 --------------------------------------------------------
        res2 = conv3x3(res, wb2_ref, b2_ref)

        # ---- CALayer: per-image avg-pool (folded into wc1) -> 1x1 -> relu
        #      -> 1x1 -> sigmoid -> per-image channel gain ------------------
        s = jnp.concatenate(
            [jnp.sum(res2[i * h:(i + 1) * h, :], axis=0, keepdims=True)
             for i in range(n)], axis=0)                          # (N, W*C)
        y = jnp.maximum(jnp.dot(s, wc1_ref[...],
                                preferred_element_type=jnp.float32)
                        + bc1_ref[...], 0.0)                      # (N, C//r)
        gain = jax.nn.sigmoid(jnp.dot(y, wc2_ref[...],
                                      preferred_element_type=jnp.float32)
                              + bc2_ref[...])                     # (N, W*C)
        res3 = jnp.concatenate(
            [res2[i * h:(i + 1) * h, :] * gain[i:i + 1, :] for i in range(n)],
            axis=0)                                               # (N*H, W*C)

        # ---- PALayer: per-pixel 1x1 -> relu -> 1x1(to 1) -> sigmoid -------
        t = jnp.maximum(jnp.dot(res3, wp1_ref[...],
                                preferred_element_type=jnp.float32)
                        + bp1_ref[...], 0.0)                      # (N*H, W*C//r)
        a = jnp.dot(t, wp2_ref[...],
                    preferred_element_type=jnp.float32) + bp2_ref[...]
        res4 = res3 * jax.nn.sigmoid(a)

        # ---- final residual, unmasked lane-dense store ---------------------
        out_ref[...] = res4 + x

    return kernel


# ---------------------------------------------------------------------------
# One-time (host-side) weight folding -- runs at init, NOT per call
# ---------------------------------------------------------------------------
def _band_conv_weight_np(w_hwio, width):
    """Fold the kw taps + channel contraction of a KxK 'same' conv into a
    block-banded matrix (K*width*Cin, width*Cout): row block kh corresponds to
    input rows shifted by kh - K//2; zero padding along W is implicit in the
    band (no wrap-around entries)."""
    k = w_hwio.shape[0]
    cin = w_hwio.shape[2]
    cout = w_hwio.shape[3]
    blocks = []
    for kh in range(k):
        blk = np.zeros((width * cin, width * cout), np.float32)
        for kw in range(k):
            dw = kw - k // 2
            shift = np.eye(width, k=-dw, dtype=np.float32)   # jin == jout + dw
            blk += np.kron(shift, w_hwio[kh, kw])
        blocks.append(blk)
    return np.concatenate(blocks, axis=0)


def fold_params(params, h, w):
    """Pre-fold all FABlock parameters into the lane-dense / banded matrices
    the kernel consumes.  Pure numpy, executed once at init time."""
    (w1, b1, w2, b2, wc1, bc1, wc2, bc2, wp1, bp1, wp2, bp2) = [
        np.asarray(p, np.float32) for p in params]
    c = w1.shape[2]
    cr = wc1.shape[1]
    eye_c = np.eye(c, dtype=np.float32)
    eye_w = np.eye(w, dtype=np.float32)

    wb1 = _band_conv_weight_np(w1, w)                        # (3*W*C, W*C)
    wb2 = _band_conv_weight_np(w2, w)
    b1e = np.tile(b1, (1, w))                                # (1, W*C)
    b2e = np.tile(b2, (1, w))
    # CALayer: fold the global average pool into the first 1x1 conv.
    wc1e = (np.tile(eye_c, (w, 1)) @ wc1) / float(h * w)     # (W*C, C//r)
    wc2e = wc2 @ np.tile(eye_c, (1, w))                      # (C//r, W*C)
    bc2e = np.tile(bc2, (1, w))                              # (1, W*C)
    # PALayer: block-diagonal per-pixel 1x1 convs + channel-broadcast of gate.
    wp1e = np.kron(eye_w, wp1)                               # (W*C, W*C//r)
    bp1e = np.tile(bp1, (1, w))                              # (1, W*C//r)
    wp2e = np.kron(eye_w, np.tile(wp2.reshape(cr, 1), (1, c)))  # (W*C//r, W*C)

    folded = (wb1, b1e, wb2, b2e, wc1e, bc1, wc2e, bc2e, wp1e, bp1e, wp2e, bp2)
    return tuple(jnp.asarray(p) for p in folded)


# ---------------------------------------------------------------------------
# Pallas wrapper (jit-friendly: only reshapes + pallas_call)
# ---------------------------------------------------------------------------
def fablock_pallas(x_nhwc, folded_params):
    n, h, w, c = x_nhwc.shape
    wcn = w * c
    x2d = x_nhwc.reshape(n * h, wcn)                         # free, lane-dense

    kernel = _make_fablock_kernel(n, h)

    def full_spec(a):
        nd = a.ndim
        return pl.BlockSpec(a.shape, lambda i, nd=nd: (0,) * nd)

    grid_spec = pltpu.PrefetchScalarGridSpec(
        num_scalar_prefetch=0,
        grid=(1,),
        in_specs=[pl.BlockSpec((n * h, wcn), lambda i: (0, 0))]
                 + [full_spec(p) for p in folded_params],
        out_specs=pl.BlockSpec((n * h, wcn), lambda i: (0, 0)),
        scratch_shapes=[pltpu.VMEM((n * (h + 1) + 1, wcn), jnp.float32)],
    )

    # Advisory cost estimate so XLA schedules surrounding ops around the call.
    ca_hid = folded_params[4].shape[1]
    pa_hid = folded_params[8].shape[1]
    flops = 2 * (2 * (n * h) * (3 * wcn) * wcn            # two banded convs
                 + (n * h) * wcn * pa_hid                  # PA 1x1 #1
                 + (n * h) * pa_hid * wcn                  # PA 1x1 #2
                 + n * wcn * ca_hid + n * ca_hid * wcn)    # CA 1x1s
    transcendentals = (n * h) * wcn + n * wcn              # sigmoids
    bytes_accessed = 4 * (2 * n * h * wcn
                          + sum(int(p.size) for p in folded_params))
    cost = pl.CostEstimate(flops=flops, transcendentals=transcendentals,
                           bytes_accessed=bytes_accessed)

    out = pl.pallas_call(
        kernel,
        out_shape=jax.ShapeDtypeStruct((n * h, wcn), jnp.float32),
        grid_spec=grid_spec,
        compiler_params=pltpu.CompilerParams(
            dimension_semantics=("arbitrary",)),
        cost_estimate=cost,
    )(x2d, *folded_params)

    return out.reshape(n, h, w, c)


# ---------------------------------------------------------------------------
# Pure-JAX reference (PyTorch semantics)
# ---------------------------------------------------------------------------
def fablock_reference(x_nhwc, params):
    (w1, b1, w2, b2, wc1, bc1, wc2, bc2, wp1, bp1, wp2, bp2) = params
    p = KSIZE // 2
    dn = ("NHWC", "HWIO", "NHWC")

    def conv2d(x, wgt, bias):
        y = lax.conv_general_dilated(x, wgt, (1, 1),
                                     [(p, p), (p, p)],
                                     dimension_numbers=dn)
        return y + bias.reshape(1, 1, 1, -1)

    res = jnp.maximum(conv2d(x_nhwc, w1, b1), 0.0) + x_nhwc
    res = conv2d(res, w2, b2)

    # CALayer
    y = jnp.mean(res, axis=(1, 2), keepdims=True)                 # (N,1,1,C)
    y = jnp.maximum(jnp.einsum("nijc,cd->nijd", y, wc1)
                    + bc1.reshape(1, 1, 1, -1), 0.0)
    y = jax.nn.sigmoid(jnp.einsum("nijd,dc->nijc", y, wc2)
                       + bc2.reshape(1, 1, 1, -1))
    res = res * y

    # PALayer
    q = jnp.maximum(jnp.einsum("nhwc,cd->nhwd", res, wp1)
                    + bp1.reshape(1, 1, 1, -1), 0.0)
    q = jax.nn.sigmoid(jnp.sum(q * wp2.reshape(1, 1, 1, -1), axis=-1,
                               keepdims=True) + bp2.reshape(1, 1, 1, 1))
    res = res * q

    return res + x_nhwc


def init_params(key, dim=DIM, ksize=KSIZE, reduction=RED):
    cr = dim // reduction
    keys = jax.random.split(key, 12)
    s = 0.1
    w1 = s * jax.random.normal(keys[0], (ksize, ksize, dim, dim), jnp.float32)
    b1 = s * jax.random.normal(keys[1], (1, dim), jnp.float32)
    w2 = s * jax.random.normal(keys[2], (ksize, ksize, dim, dim), jnp.float32)
    b2 = s * jax.random.normal(keys[3], (1, dim), jnp.float32)
    # CALayer 1x1 convs: (C -> C//r), (C//r -> C)
    wc1 = s * jax.random.normal(keys[4], (dim, cr), jnp.float32)
    bc1 = s * jax.random.normal(keys[5], (1, cr), jnp.float32)
    wc2 = s * jax.random.normal(keys[6], (cr, dim), jnp.float32)
    bc2 = s * jax.random.normal(keys[7], (1, dim), jnp.float32)
    # PALayer 1x1 convs: (C -> C//r), (C//r -> 1)
    wp1 = s * jax.random.normal(keys[8], (dim, cr), jnp.float32)
    bp1 = s * jax.random.normal(keys[9], (1, cr), jnp.float32)
    wp2 = s * jax.random.normal(keys[10], (1, cr), jnp.float32)
    bp2 = s * jax.random.normal(keys[11], (1, 1), jnp.float32)
    return (w1, b1, w2, b2, wc1, bc1, wc2, bc2, wp1, bp1, wp2, bp2)


if __name__ == "__main__":
    key = jax.random.PRNGKey(0)
    kx, kp = jax.random.split(key)
    # input corresponding to torch NCHW (N, dim, H, W) = (2, 16, 16, 16),
    # stored here as NHWC (2, 16, 16, 16)
    x = jax.random.normal(kx, (N, H, W, DIM), jnp.float32)
    params = init_params(kp)

    # One-time host-side weight folding (hoisted out of the call path).
    folded = fold_params(params, H, W)

    fab = jax.jit(fablock_pallas)
    out = fab(x, folded)
    out = jax.block_until_ready(out)

    ref = fablock_reference(x, params)
    ref = jax.block_until_ready(ref)

    err = float(jnp.max(jnp.abs(out - ref)))
    assert err < 1e-4, f"mismatch vs reference: max abs err = {err}"
    print("KERNEL_OK")
</pallas_src>

<mosaic_0001>
module attributes {stable_mosaic.version = 11 : i64} {
  func.func @kernel(%arg0: i32, %arg1: memref<32x256xf32, #tpu.memory_space<vmem>>, %arg2: memref<768x256xf32, #tpu.memory_space<vmem>>, %arg3: memref<1x256xf32, #tpu.memory_space<vmem>>, %arg4: memref<768x256xf32, #tpu.memory_space<vmem>>, %arg5: memref<1x256xf32, #tpu.memory_space<vmem>>, %arg6: memref<256x2xf32, #tpu.memory_space<vmem>>, %arg7: memref<1x2xf32, #tpu.memory_space<vmem>>, %arg8: memref<2x256xf32, #tpu.memory_space<vmem>>, %arg9: memref<1x256xf32, #tpu.memory_space<vmem>>, %arg10: memref<256x32xf32, #tpu.memory_space<vmem>>, %arg11: memref<1x32xf32, #tpu.memory_space<vmem>>, %arg12: memref<32x256xf32, #tpu.memory_space<vmem>>, %arg13: memref<1x1xf32, #tpu.memory_space<vmem>>, %arg14: memref<32x256xf32, #tpu.memory_space<vmem>>, %arg15: memref<35x256xf32, #tpu.memory_space<vmem>>) attributes {dimension_semantics = [#tpu.dimension_semantics<arbitrary>], iteration_bounds = array<i64: 1>, scalar_prefetch = 0 : i64, scratch_operands = 1 : i64, tpu.core_type = #tpu.core_type<tc>, window_params = [{pipeline_mode = #tpu.pipeline_mode<synchronous>, transform_indices = @transform_0, window_bounds = array<i64: 32, 256>}, {pipeline_mode = #tpu.pipeline_mode<synchronous>, transform_indices = @transform_1, window_bounds = array<i64: 768, 256>}, {pipeline_mode = #tpu.pipeline_mode<synchronous>, transform_indices = @transform_2, window_bounds = array<i64: 1, 256>}, {pipeline_mode = #tpu.pipeline_mode<synchronous>, transform_indices = @transform_3, window_bounds = array<i64: 768, 256>}, {pipeline_mode = #tpu.pipeline_mode<synchronous>, transform_indices = @transform_4, window_bounds = array<i64: 1, 256>}, {pipeline_mode = #tpu.pipeline_mode<synchronous>, transform_indices = @transform_5, window_bounds = array<i64: 256, 2>}, {pipeline_mode = #tpu.pipeline_mode<synchronous>, transform_indices = @transform_6, window_bounds = array<i64: 1, 2>}, {pipeline_mode = #tpu.pipeline_mode<synchronous>, transform_indices = @transform_7, window_bounds = array<i64: 2, 256>}, {pipeline_mode = #tpu.pipeline_mode<synchronous>, transform_indices = @transform_8, window_bounds = array<i64: 1, 256>}, {pipeline_mode = #tpu.pipeline_mode<synchronous>, transform_indices = @transform_9, window_bounds = array<i64: 256, 32>}, {pipeline_mode = #tpu.pipeline_mode<synchronous>, transform_indices = @transform_10, window_bounds = array<i64: 1, 32>}, {pipeline_mode = #tpu.pipeline_mode<synchronous>, transform_indices = @transform_11, window_bounds = array<i64: 32, 256>}, {pipeline_mode = #tpu.pipeline_mode<synchronous>, transform_indices = @transform_12, window_bounds = array<i64: 1, 1>}, {pipeline_mode = #tpu.pipeline_mode<synchronous>, transform_indices = @transform_13, window_bounds = array<i64: 32, 256>}]} {
    %cst = arith.constant 0.000000e+00 : f32
    %0 = vector.broadcast %cst : f32 to vector<1x256xf32>
    %c0 = arith.constant 0 : index
    %c0_0 = arith.constant 0 : index
    %1 = vector.load %arg15[%c0, %c0_0] : memref<35x256xf32, #tpu.memory_space<vmem>>, vector<1x256xf32>
    tpu.vector_store %arg15[%c0, %c0_0], %0 {strides = array<i32>} : memref<35x256xf32, #tpu.memory_space<vmem>>, vector<1x256xf32>,
    %c17 = arith.constant 17 : index
    %c0_1 = arith.constant 0 : index
    %2 = vector.load %arg15[%c17, %c0_1] : memref<35x256xf32, #tpu.memory_space<vmem>>, vector<1x256xf32>
    tpu.vector_store %arg15[%c17, %c0_1], %0 {strides = array<i32>} : memref<35x256xf32, #tpu.memory_space<vmem>>, vector<1x256xf32>,
    %c34 = arith.constant 34 : index
    %c0_2 = arith.constant 0 : index
    %3 = vector.load %arg15[%c34, %c0_2] : memref<35x256xf32, #tpu.memory_space<vmem>>, vector<1x256xf32>
    tpu.vector_store %arg15[%c34, %c0_2], %0 {strides = array<i32>} : memref<35x256xf32, #tpu.memory_space<vmem>>, vector<1x256xf32>,
    %c0_3 = arith.constant 0 : index
    %c0_4 = arith.constant 0 : index
    %4 = vector.load %arg1[%c0_3, %c0_4] : memref<32x256xf32, #tpu.memory_space<vmem>>, vector<32x256xf32>
    %5 = vector.extract_strided_slice %4 {offsets = [0, 0], sizes = [16, 256], strides = [1, 1]} : vector<32x256xf32> to vector<16x256xf32>
    %c1 = arith.constant 1 : index
    %c0_5 = arith.constant 0 : index
    %6 = vector.load %arg15[%c1, %c0_5] : memref<35x256xf32, #tpu.memory_space<vmem>>, vector<16x256xf32>
    tpu.vector_store %arg15[%c1, %c0_5], %5 {strides = array<i32>} : memref<35x256xf32, #tpu.memory_space<vmem>>, vector<16x256xf32>,
    %7 = vector.extract_strided_slice %4 {offsets = [16, 0], sizes = [16, 256], strides = [1, 1]} : vector<32x256xf32> to vector<16x256xf32>
    %c18 = arith.constant 18 : index
    %c0_6 = arith.constant 0 : index
    %8 = vector.load %arg15[%c18, %c0_6] : memref<35x256xf32, #tpu.memory_space<vmem>>, vector<16x256xf32>
    tpu.vector_store %arg15[%c18, %c0_6], %7 {strides = array<i32>} : memref<35x256xf32, #tpu.memory_space<vmem>>, vector<16x256xf32>,
    %c0_7 = arith.constant 0 : index
    %c0_8 = arith.constant 0 : index
    %9 = vector.load %arg15[%c0_7, %c0_8] : memref<35x256xf32, #tpu.memory_space<vmem>>, vector<16x256xf32>
    %10 = vector.extract_strided_slice %4 {offsets = [0, 0], sizes = [16, 256], strides = [1, 1]} : vector<32x256xf32> to vector<16x256xf32>
    %c2 = arith.constant 2 : index
    %c0_9 = arith.constant 0 : index
    %11 = vector.load %arg15[%c2, %c0_9] : memref<35x256xf32, #tpu.memory_space<vmem>>, vector<16x256xf32>
    %12 = tpu.concatenate %9, %10, %11 in 1 : vector<16x256xf32>, vector<16x256xf32>, vector<16x256xf32> -> vector<16x768xf32>
    %c17_10 = arith.constant 17 : index
    %c0_11 = arith.constant 0 : index
    %13 = vector.load %arg15[%c17_10, %c0_11] : memref<35x256xf32, #tpu.memory_space<vmem>>, vector<16x256xf32>
    %14 = vector.extract_strided_slice %4 {offsets = [16, 0], sizes = [16, 256], strides = [1, 1]} : vector<32x256xf32> to vector<16x256xf32>
    %c19 = arith.constant 19 : index
    %c0_12 = arith.constant 0 : index
    %15 = vector.load %arg15[%c19, %c0_12] : memref<35x256xf32, #tpu.memory_space<vmem>>, vector<16x256xf32>
    %16 = tpu.concatenate %13, %14, %15 in 1 : vector<16x256xf32>, vector<16x256xf32>, vector<16x256xf32> -> vector<16x768xf32>
    %17 = tpu.concatenate %12, %16 in 0 : vector<16x768xf32>, vector<16x768xf32> -> vector<32x768xf32>
    %c0_13 = arith.constant 0 : index
    %c0_14 = arith.constant 0 : index
    %18 = vector.load %arg2[%c0_13, %c0_14] : memref<768x256xf32, #tpu.memory_space<vmem>>, vector<768x256xf32>
    %cst_15 = arith.constant dense<0.000000e+00> : vector<32x256xf32>
    %19 = tpu.matmul %17, %18, %cst_15 {dimension_numbers = #tpu.dot_dimension_numbers<[1], [0], [0], [1], [0, 0, 1, 1], [], []>} : vector<32x768xf32>, vector<768x256xf32>, vector<32x256xf32> -> vector<32x256xf32>
    %c0_16 = arith.constant 0 : index
    %c0_17 = arith.constant 0 : index
    %20 = vector.load %arg3[%c0_16, %c0_17] : memref<1x256xf32, #tpu.memory_space<vmem>>, vector<1x256xf32>
    %21 = vector.broadcast %20 : vector<1x256xf32> to vector<32x256xf32>
    %22 = arith.addf %19, %21 : vector<32x256xf32>
    %cst_18 = arith.constant 0.000000e+00 : f32
    %23 = vector.broadcast %cst_18 : f32 to vector<32x256xf32>
    %24 = arith.maximumf %22, %23 : vector<32x256xf32>
    %25 = arith.addf %24, %4 : vector<32x256xf32>
    %26 = vector.extract_strided_slice %25 {offsets = [0, 0], sizes = [16, 256], strides = [1, 1]} : vector<32x256xf32> to vector<16x256xf32>
    %c1_19 = arith.constant 1 : index
    %c0_20 = arith.constant 0 : index
    %27 = vector.load %arg15[%c1_19, %c0_20] : memref<35x256xf32, #tpu.memory_space<vmem>>, vector<16x256xf32>
    tpu.vector_store %arg15[%c1_19, %c0_20], %26 {strides = array<i32>} : memref<35x256xf32, #tpu.memory_space<vmem>>, vector<16x256xf32>,
    %28 = vector.extract_strided_slice %25 {offsets = [16, 0], sizes = [16, 256], strides = [1, 1]} : vector<32x256xf32> to vector<16x256xf32>
    %c18_21 = arith.constant 18 : index
    %c0_22 = arith.constant 0 : index
    %29 = vector.load %arg15[%c18_21, %c0_22] : memref<35x256xf32, #tpu.memory_space<vmem>>, vector<16x256xf32>
    tpu.vector_store %arg15[%c18_21, %c0_22], %28 {strides = array<i32>} : memref<35x256xf32, #tpu.memory_space<vmem>>, vector<16x256xf32>,
    %c0_23 = arith.constant 0 : index
    %c0_24 = arith.constant 0 : index
    %30 = vector.load %arg15[%c0_23, %c0_24] : memref<35x256xf32, #tpu.memory_space<vmem>>, vector<16x256xf32>
    %31 = vector.extract_strided_slice %25 {offsets = [0, 0], sizes = [16, 256], strides = [1, 1]} : vector<32x256xf32> to vector<16x256xf32>
    %c2_25 = arith.constant 2 : index
    %c0_26 = arith.constant 0 : index
    %32 = vector.load %arg15[%c2_25, %c0_26] : memref<35x256xf32, #tpu.memory_space<vmem>>, vector<16x256xf32>
    %33 = tpu.concatenate %30, %31, %32 in 1 : vector<16x256xf32>, vector<16x256xf32>, vector<16x256xf32> -> vector<16x768xf32>
    %c17_27 = arith.constant 17 : index
    %c0_28 = arith.constant 0 : index
    %34 = vector.load %arg15[%c17_27, %c0_28] : memref<35x256xf32, #tpu.memory_space<vmem>>, vector<16x256xf32>
    %35 = vector.extract_strided_slice %25 {offsets = [16, 0], sizes = [16, 256], strides = [1, 1]} : vector<32x256xf32> to vector<16x256xf32>
    %c19_29 = arith.constant 19 : index
    %c0_30 = arith.constant 0 : index
    %36 = vector.load %arg15[%c19_29, %c0_30] : memref<35x256xf32, #tpu.memory_space<vmem>>, vector<16x256xf32>
    %37 = tpu.concatenate %34, %35, %36 in 1 : vector<16x256xf32>, vector<16x256xf32>, vector<16x256xf32> -> vector<16x768xf32>
    %38 = tpu.concatenate %33, %37 in 0 : vector<16x768xf32>, vector<16x768xf32> -> vector<32x768xf32>
    %c0_31 = arith.constant 0 : index
    %c0_32 = arith.constant 0 : index
    %39 = vector.load %arg4[%c0_31, %c0_32] : memref<768x256xf32, #tpu.memory_space<vmem>>, vector<768x256xf32>
    %cst_33 = arith.constant dense<0.000000e+00> : vector<32x256xf32>
    %40 = tpu.matmul %38, %39, %cst_33 {dimension_numbers = #tpu.dot_dimension_numbers<[1], [0], [0], [1], [0, 0, 1, 1], [], []>} : vector<32x768xf32>, vector<768x256xf32>, vector<32x256xf32> -> vector<32x256xf32>
    %c0_34 = arith.constant 0 : index
    %c0_35 = arith.constant 0 : index
    %41 = vector.load %arg5[%c0_34, %c0_35] : memref<1x256xf32, #tpu.memory_space<vmem>>, vector<1x256xf32>
    %42 = vector.broadcast %41 : vector<1x256xf32> to vector<32x256xf32>
    %43 = arith.addf %40, %42 : vector<32x256xf32>
    %44 = vector.extract_strided_slice %43 {offsets = [0, 0], sizes = [16, 256], strides = [1, 1]} : vector<32x256xf32> to vector<16x256xf32>
    %cst_36 = arith.constant dense<0.000000e+00> : vector<256xf32>
    %45 = vector.multi_reduction <add>, %44, %cst_36 [0] : vector<16x256xf32> to vector<256xf32>
    %46 = vector.shape_cast %45 : vector<256xf32> to vector<1x256xf32>
    %47 = vector.extract_strided_slice %43 {offsets = [16, 0], sizes = [16, 256], strides = [1, 1]} : vector<32x256xf32> to vector<16x256xf32>
    %cst_37 = arith.constant dense<0.000000e+00> : vector<256xf32>
    %48 = vector.multi_reduction <add>, %47, %cst_37 [0] : vector<16x256xf32> to vector<256xf32>
    %49 = vector.shape_cast %48 : vector<256xf32> to vector<1x256xf32>
    %50 = tpu.concatenate %46, %49 in 0 : vector<1x256xf32>, vector<1x256xf32> -> vector<2x256xf32>
    %c0_38 = arith.constant 0 : index
    %c0_39 = arith.constant 0 : index
    %51 = vector.load %arg6[%c0_38, %c0_39] : memref<256x2xf32, #tpu.memory_space<vmem>>, vector<256x2xf32>
    %cst_40 = arith.constant dense<0.000000e+00> : vector<2x2xf32>
    %52 = tpu.matmul %50, %51, %cst_40 {dimension_numbers = #tpu.dot_dimension_numbers<[1], [0], [0], [1], [0, 0, 1, 1], [], []>} : vector<2x256xf32>, vector<256x2xf32>, vector<2x2xf32> -> vector<2x2xf32>
    %c0_41 = arith.constant 0 : index
    %c0_42 = arith.constant 0 : index
    %53 = vector.load %arg7[%c0_41, %c0_42] : memref<1x2xf32, #tpu.memory_space<vmem>>, vector<1x2xf32>
    %54 = vector.broadcast %53 : vector<1x2xf32> to vector<2x2xf32>
    %55 = arith.addf %52, %54 : vector<2x2xf32>
    %cst_43 = arith.constant 0.000000e+00 : f32
    %56 = vector.broadcast %cst_43 : f32 to vector<2x2xf32>
    %57 = arith.maximumf %55, %56 : vector<2x2xf32>
    %c0_44 = arith.constant 0 : index
    %c0_45 = arith.constant 0 : index
    %58 = vector.load %arg8[%c0_44, %c0_45] : memref<2x256xf32, #tpu.memory_space<vmem>>, vector<2x256xf32>
    %cst_46 = arith.constant dense<0.000000e+00> : vector<2x256xf32>
    %59 = tpu.matmul %57, %58, %cst_46 {dimension_numbers = #tpu.dot_dimension_numbers<[1], [0], [0], [1], [0, 0, 1, 1], [], []>} : vector<2x2xf32>, vector<2x256xf32>, vector<2x256xf32> -> vector<2x256xf32>
    %c0_47 = arith.constant 0 : index
    %c0_48 = arith.constant 0 : index
    %60 = vector.load %arg9[%c0_47, %c0_48] : memref<1x256xf32, #tpu.memory_space<vmem>>, vector<1x256xf32>
    %61 = vector.broadcast %60 : vector<1x256xf32> to vector<2x256xf32>
    %62 = arith.addf %59, %61 : vector<2x256xf32>
    %63 = arith.negf %62 : vector<2x256xf32>
    %64 = math.exp %63 : vector<2x256xf32>
    %cst_49 = arith.constant 1.000000e+00 : f32
    %65 = vector.broadcast %cst_49 : f32 to vector<2x256xf32>
    %66 = arith.addf %65, %64 : vector<2x256xf32>
    %67 = arith.divf %65, %66 : vector<2x256xf32>
    %68 = vector.extract_strided_slice %43 {offsets = [0, 0], sizes = [16, 256], strides = [1, 1]} : vector<32x256xf32> to vector<16x256xf32>
    %69 = vector.extract_strided_slice %67 {offsets = [0, 0], sizes = [1, 256], strides = [1, 1]} : vector<2x256xf32> to vector<1x256xf32>
    %70 = vector.broadcast %69 : vector<1x256xf32> to vector<16x256xf32>
    %71 = arith.mulf %68, %70 : vector<16x256xf32>
    %72 = vector.extract_strided_slice %43 {offsets = [16, 0], sizes = [16, 256], strides = [1, 1]} : vector<32x256xf32> to vector<16x256xf32>
    %73 = vector.extract_strided_slice %67 {offsets = [1, 0], sizes = [1, 256], strides = [1, 1]} : vector<2x256xf32> to vector<1x256xf32>
    %74 = vector.broadcast %73 : vector<1x256xf32> to vector<16x256xf32>
    %75 = arith.mulf %72, %74 : vector<16x256xf32>
    %76 = tpu.concatenate %71, %75 in 0 : vector<16x256xf32>, vector<16x256xf32> -> vector<32x256xf32>
    %c0_50 = arith.constant 0 : index
    %c0_51 = arith.constant 0 : index
    %77 = vector.load %arg10[%c0_50, %c0_51] : memref<256x32xf32, #tpu.memory_space<vmem>>, vector<256x32xf32>
    %cst_52 = arith.constant dense<0.000000e+00> : vector<32x32xf32>
    %78 = tpu.matmul %76, %77, %cst_52 {dimension_numbers = #tpu.dot_dimension_numbers<[1], [0], [0], [1], [0, 0, 1, 1], [], []>} : vector<32x256xf32>, vector<256x32xf32>, vector<32x32xf32> -> vector<32x32xf32>
    %c0_53 = arith.constant 0 : index
    %c0_54 = arith.constant 0 : index
    %79 = vector.load %arg11[%c0_53, %c0_54] : memref<1x32xf32, #tpu.memory_space<vmem>>, vector<1x32xf32>
    %80 = vector.broadcast %79 : vector<1x32xf32> to vector<32x32xf32>
    %81 = arith.addf %78, %80 : vector<32x32xf32>
    %cst_55 = arith.constant 0.000000e+00 : f32
    %82 = vector.broadcast %cst_55 : f32 to vector<32x32xf32>
    %83 = arith.maximumf %81, %82 : vector<32x32xf32>
    %c0_56 = arith.constant 0 : index
    %c0_57 = arith.constant 0 : index
    %84 = vector.load %arg12[%c0_56, %c0_57] : memref<32x256xf32, #tpu.memory_space<vmem>>, vector<32x256xf32>
    %cst_58 = arith.constant dense<0.000000e+00> : vector<32x256xf32>
    %85 = tpu.matmul %83, %84, %cst_58 {dimension_numbers = #tpu.dot_dimension_numbers<[1], [0], [0], [1], [0, 0, 1, 1], [], []>} : vector<32x32xf32>, vector<32x256xf32>, vector<32x256xf32> -> vector<32x256xf32>
    %c0_59 = arith.constant 0 : index
    %c0_60 = arith.constant 0 : index
    %86 = vector.load %arg13[%c0_59, %c0_60] : memref<1x1xf32, #tpu.memory_space<vmem>>, vector<1x1xf32>
    %87 = vector.broadcast %86 : vector<1x1xf32> to vector<32x256xf32>
    %88 = arith.addf %85, %87 : vector<32x256xf32>
    %89 = arith.negf %88 : vector<32x256xf32>
    %90 = math.exp %89 : vector<32x256xf32>
    %cst_61 = arith.constant 1.000000e+00 : f32
    %91 = vector.broadcast %cst_61 : f32 to vector<32x256xf32>
    %92 = arith.addf %91, %90 : vector<32x256xf32>
    %93 = arith.divf %91, %92 : vector<32x256xf32>
    %94 = arith.mulf %76, %93 : vector<32x256xf32>
    %95 = arith.addf %94, %4 : vector<32x256xf32>
    %c0_62 = arith.constant 0 : index
    %c0_63 = arith.constant 0 : index
    %96 = vector.load %arg14[%c0_62, %c0_63] : memref<32x256xf32, #tpu.memory_space<vmem>>, vector<32x256xf32>
    tpu.vector_store %arg14[%c0_62, %c0_63], %95 {strides = array<i32>} : memref<32x256xf32, #tpu.memory_space<vmem>>, vector<32x256xf32>,
    return
  }
  func.func @transform_0(%arg0: i32) -> (i32, i32) {
    %c0_i32 = arith.constant 0 : i32
    %c0_i32_0 = arith.constant 0 : i32
    %c0_i32_1 = arith.constant 0 : i32
    return %c0_i32, %c0_i32_0 : i32, i32
  }
  func.func @transform_1(%arg0: i32) -> (i32, i32) {
    %c0_i32 = arith.constant 0 : i32
    %c0_i32_0 = arith.constant 0 : i32
    %c0_i32_1 = arith.constant 0 : i32
    return %c0_i32, %c0_i32_0 : i32, i32
  }
  func.func @transform_2(%arg0: i32) -> (i32, i32) {
    %c0_i32 = arith.constant 0 : i32
    %c0_i32_0 = arith.constant 0 : i32
    %c0_i32_1 = arith.constant 0 : i32
    return %c0_i32, %c0_i32_0 : i32, i32
  }
  func.func @transform_3(%arg0: i32) -> (i32, i32) {
    %c0_i32 = arith.constant 0 : i32
    %c0_i32_0 = arith.constant 0 : i32
    %c0_i32_1 = arith.constant 0 : i32
    return %c0_i32, %c0_i32_0 : i32, i32
  }
  func.func @transform_4(%arg0: i32) -> (i32, i32) {
    %c0_i32 = arith.constant 0 : i32
    %c0_i32_0 = arith.constant 0 : i32
    %c0_i32_1 = arith.constant 0 : i32
    return %c0_i32, %c0_i32_0 : i32, i32
  }
  func.func @transform_5(%arg0: i32) -> (i32, i32) {
    %c0_i32 = arith.constant 0 : i32
    %c0_i32_0 = arith.constant 0 : i32
    %c0_i32_1 = arith.constant 0 : i32
    return %c0_i32, %c0_i32_0 : i32, i32
  }
  func.func @transform_6(%arg0: i32) -> (i32, i32) {
    %c0_i32 = arith.constant 0 : i32
    %c0_i32_0 = arith.constant 0 : i32
    %c0_i32_1 = arith.constant 0 : i32
    return %c0_i32, %c0_i32_0 : i32, i32
  }
  func.func @transform_7(%arg0: i32) -> (i32, i32) {
    %c0_i32 = arith.constant 0 : i32
    %c0_i32_0 = arith.constant 0 : i32
    %c0_i32_1 = arith.constant 0 : i32
    return %c0_i32, %c0_i32_0 : i32, i32
  }
  func.func @transform_8(%arg0: i32) -> (i32, i32) {
    %c0_i32 = arith.constant 0 : i32
    %c0_i32_0 = arith.constant 0 : i32
    %c0_i32_1 = arith.constant 0 : i32
    return %c0_i32, %c0_i32_0 : i32, i32
  }
  func.func @transform_9(%arg0: i32) -> (i32, i32) {
    %c0_i32 = arith.constant 0 : i32
    %c0_i32_0 = arith.constant 0 : i32
    %c0_i32_1 = arith.constant 0 : i32
    return %c0_i32, %c0_i32_0 : i32, i32
  }
  func.func @transform_10(%arg0: i32) -> (i32, i32) {
    %c0_i32 = arith.constant 0 : i32
    %c0_i32_0 = arith.constant 0 : i32
    %c0_i32_1 = arith.constant 0 : i32
    return %c0_i32, %c0_i32_0 : i32, i32
  }
  func.func @transform_11(%arg0: i32) -> (i32, i32) {
    %c0_i32 = arith.constant 0 : i32
    %c0_i32_0 = arith.constant 0 : i32
    %c0_i32_1 = arith.constant 0 : i32
    return %c0_i32, %c0_i32_0 : i32, i32
  }
  func.func @transform_12(%arg0: i32) -> (i32, i32) {
    %c0_i32 = arith.constant 0 : i32
    %c0_i32_0 = arith.constant 0 : i32
    %c0_i32_1 = arith.constant 0 : i32
    return %c0_i32, %c0_i32_0 : i32, i32
  }
  func.func @transform_13(%arg0: i32) -> (i32, i32) {
    %c0_i32 = arith.constant 0 : i32
    %c0_i32_0 = arith.constant 0 : i32
    %c0_i32_1 = arith.constant 0 : i32
    return %c0_i32, %c0_i32_0 : i32, i32
  }
}

</mosaic_0001>

<bundles_post_ra>
// kernel: fablock_pallas.1
= control target key start
LH: loop header
LB: loop body
LE: loop exit
PB: predicated region body
PF: predicated region fallthrough
CT: control target
= control target key end

     0   :  { %s3375_s0 = inlined_call_operand.vmem [shape: f32[32,256], index: 0, kind: input, shape index: {}]   ;;  %s3376_s1 = inlined_call_operand.hbm [shape: f32[768,256], index: 1, kind: input, shape index: {}]   ;;  %s3377_s2 = inlined_call_operand.vmem [shape: f32[1,256], index: 2, kind: input, shape index: {}]   ;;  %s3378_s3 = inlined_call_operand.hbm [shape: f32[768,256], index: 3, kind: input, shape index: {}]   ;;  %s3379_s4 = inlined_call_operand.vmem [shape: f32[1,256], index: 4, kind: input, shape index: {}]   ;;  %s3380_s5 = inlined_call_operand.vmem [shape: f32[256,2], index: 5, kind: input, shape index: {}]   ;;  %s3381_s6 = inlined_call_operand.vmem [shape: f32[1,2], index: 6, kind: input, shape index: {}]   ;;  %s3382_s7 = inlined_call_operand.vmem [shape: f32[2,256], index: 7, kind: input, shape index: {}]   ;;  %s3383_s8 = inlined_call_operand.vmem [shape: f32[1,256], index: 8, kind: input, shape index: {}]   ;;  %s3384_s9 = inlined_call_operand.vmem [shape: f32[256,32], index: 9, kind: input, shape index: {}]   ;;  %s3385_s10 = inlined_call_operand.vmem [shape: f32[1,32], index: 10, kind: input, shape index: {}]   ;;  %s3386_s11 = inlined_call_operand.vmem [shape: f32[32,256], index: 11, kind: input, shape index: {}]   ;;  %s3387_s12 = inlined_call_operand.<no memory space> [shape: f32[1,1], index: 12, kind: input, shape index: {}]   ;;  %s3388_s13 = inlined_call_operand.vmem [shape: f32[32,256], index: 13, kind: output, shape index: {}]  }
   0x1   :  { %v18_v0 = vstv %s3387_s12 }
   0x2   :  { %19 = vst [vmem:[#allocation3] sm:$0x1] %v18_v0 }
   0x3   :  { %20 = vsyncpa [#allocation5], 0 }
   0x4   :  { %21 = vsyncpa [#allocation7], 0  ;;  %s2678_s27 = smov [#allocation4]   ;;  %s2630_s14 = scalar_lea.hbm %s3376_s1, 24576 }
   0x5   :  { %s29_s28 = sshll.u32 %s2678_s27, 4  ;;  %p2631_p0 = scmp.ne.s32.totalorder %s3376_s1, %s2630_s14  ;;  %s30_s28 = int_to_ptr.vmem [resolvable:$true] %s29_s28 }
   0x6   :  { %p2634_p1 = scmp.lt.u32.totalorder %s2630_s14, %s3376_s1 }
   0x8   :  { %p2636_p2 = pnand %p2634_p1, %p2631_p0 }
   0xa   :  { %2639 = shalt.err (!%p2636_p2)
}
   0xb   :  { %s2640_s12 = scalar_lea.vmem %s30_s28, 24576  ;;  %p2645_p4 = scmp.lt.s32.totalorder %s30_s28, %s30_s28 }
   0xc   :  { %p2641_p3 = scmp.ne.s32.totalorder %s30_s28, %s2640_s12  ;;  %p2646_p5 = scmp.lt.s32.totalorder %s2640_s12, %s2640_s12 }
   0xe   :  { %p2647_p6 = por %p2646_p5, %p2645_p4 }
  0x10   :  { %p2648_p7 = pnand %p2647_p6, %p2641_p3 }
  0x12   :  { %2651 = shalt.err (!%p2648_p7)
}
  0x13   :  { %s2679_s19 = smov 256   ;;  %s2680_s20 = smov 16  }
  0x14   :  { %35 = dma.hbm_to_vmem [thread:$0]  %s3376_s1, 24576, %s30_s28, [#allocation5], %s2679_s19, %s2679_s19, %s2680_s20  }
  0x15   :  { %s2681_s23 = smov [#allocation6]   ;;  %s2652_s27 = scalar_lea.hbm %s3378_s3, 24576 }
  0x16   :  { %s43_s24 = sshll.u32 %s2681_s23, 4  ;;  %p2653_p8 = scmp.ne.s32.totalorder %s3378_s3, %s2652_s27  ;;  %s44_s24 = int_to_ptr.vmem [resolvable:$true] %s43_s24 }
  0x17   :  { %p2656_p9 = scmp.lt.u32.totalorder %s2652_s27, %s3378_s3 }
  0x19   :  { %p2658_p10 = pnand %p2656_p9, %p2653_p8 }
  0x1b   :  { %2661 = shalt.err (!%p2658_p10)
}
  0x1c   :  { %s2662_s16 = scalar_lea.vmem %s44_s24, 24576  ;;  %p2667_p12 = scmp.lt.s32.totalorder %s44_s24, %s44_s24 }
  0x1d   :  { %p2663_p11 = scmp.ne.s32.totalorder %s44_s24, %s2662_s16  ;;  %p2668_p13 = scmp.lt.s32.totalorder %s2662_s16, %s2662_s16 }
  0x1f   :  { %p2669_p0 = por %p2668_p13, %p2667_p12 }
  0x21   :  { %p2670_p1 = pnand %p2669_p0, %p2663_p11 }
  0x23   :  { %2673 = shalt.err (!%p2670_p1)
}
  0x24   :  { %49 = dma.hbm_to_vmem [thread:$0]  %s3378_s3, 24576, %s44_s24, [#allocation7], %s2679_s19, %s2679_s19, %s2680_s20  }
  0x25   :  { %2674 = dma.done.wait [#allocation5], 24576  }
  0x26   :  { %2675 = vsyncadd [#allocation5], 4294942720 }
  0x27   :  { %2676 = dma.done.wait [#allocation7], 24576  }
  0x28   :  { %2677 = vsyncadd [#allocation7], 4294942720  ;;  %v74_v1 = vlaneseq  ;;  %v2682_v2 = vmov 0.0   ;;  %v249_v3 = vld [vmem:[#allocation4 + $0x8] sm:$0xff]  ;;  %v251_v4 = vld [vmem:[#allocation4 + $0x18] sm:$0xff]  ;;  %vm121_vm1 = vcmask 1041408  }
  0x29   :  { %v248_v5 = vld [vmem:[#allocation4] sm:$0xff]  ;;  %v2059_v6 = vpack.c.bf16 %v251_v4, %v249_v3  ;;  %v250_v7 = vld [vmem:[#allocation4 + $0x10] sm:$0xff]  ;;  %v253_v8 = vld [vmem:[#allocation4 + $0x28] sm:$0xff]  ;;  %vm98_vm2 = vcmask 1040384   ;;  %vm205_vm3 = vcmask 1046528   ;;  %vm154_vm4 = vcmask 1045504  }
  0x2a   :  { %vm76_vm0 = vcmp.lt.s32.totalorder %v74_v1, 256  ;;  %v255_v9 = vld [vmem:[#allocation4 + $0x38] sm:$0xff]  ;;  %v2061_v10 = vpack.c.bf16 %v250_v7, %v248_v5  ;;  %v252_v12 = vld [vmem:[#allocation4 + $0x20] sm:$0xff]  ;;  %v254_v13 = vld [vmem:[#allocation4 + $0x30] sm:$0xff]  ;;  %vm1518_vm5 = vcmask 15360   ;;  %vm1779_vm6 = vcmask 261120  }
  0x2b   :  { %78 = vst.msk [vmem:[#allocation2] ss:$8 sm:$0x3] %vm76_vm0, %v2682_v2  ;;  %81 = vst.msk [vmem:[#allocation2 + $0x21] ss:$8 sm:$0x3] %vm76_vm0, %v2682_v2  ;;  %v2063_v11 = vpack.c.bf16 %v255_v9, %v253_v8  ;;  %2060 = vmatprep.subr.bf16.mxu0 %v2059_v6  ;;  %v2065_v16 = vpack.c.bf16 %v254_v13, %v252_v12 }
  0x2c   :  { %84 = vst.msk [vmem:[#allocation2 + $0x42] ss:$8 sm:$0x3] %vm76_vm0, %v2682_v2  ;;  %v257_v14 = vld [vmem:[#allocation4 + $0x48] sm:$0xff]  ;;  %v259_v15 = vld [vmem:[#allocation4 + $0x58] sm:$0xff]  ;;  %2062 = vmatpush1.bf16.msra.mxu0 %v2061_v10  ;;  %v256_v18 = vld [vmem:[#allocation4 + $0x40] sm:$0xff] }
  0x2d   :  { %2064 = vmatprep.subr.bf16.mxu0 %v2063_v11  ;;  %v2067_v17 = vpack.c.bf16 %v259_v15, %v257_v14  ;;  %v258_v19 = vld [vmem:[#allocation4 + $0x50] sm:$0xff]  ;;  %v261_v20 = vld [vmem:[#allocation4 + $0x68] sm:$0xff]  ;;  %v263_v21 = vld [vmem:[#allocation4 + $0x78] sm:$0xff] }
  0x2e   :  { %v2069_v22 = vpack.c.bf16 %v258_v19, %v256_v18  ;;  %v2071_v23 = vpack.c.bf16 %v263_v21, %v261_v20  ;;  %v260_v24 = vld [vmem:[#allocation4 + $0x60] sm:$0xff]  ;;  %v262_v25 = vld [vmem:[#allocation4 + $0x70] sm:$0xff]  ;;  %v265_v26 = vld [vmem:[#allocation4 + $0x88] sm:$0xff] }
  0x2f   :  { %v267_v27 = vld [vmem:[#allocation4 + $0x98] sm:$0xff]  ;;  %v2073_v28 = vpack.c.bf16 %v262_v25, %v260_v24  ;;  %v264_v30 = vld [vmem:[#allocation4 + $0x80] sm:$0xff]  ;;  %v266_v31 = vld [vmem:[#allocation4 + $0x90] sm:$0xff] }
  0x30   :  { %2066 = vmatpush1.bf16.msra.mxu0 %v2065_v16  ;;  %v2075_v29 = vpack.c.bf16 %v267_v27, %v265_v26  ;;  %v269_v32 = vld [vmem:[#allocation4 + $0xa8] sm:$0xff]  ;;  %v271_v33 = vld [vmem:[#allocation4 + $0xb8] sm:$0xff]  ;;  %v2077_v34 = vpack.c.bf16 %v266_v31, %v264_v30  ;;  %v268_v36 = vld [vmem:[#allocation4 + $0xa0] sm:$0xff] }
  0x31   :  { %2068 = vmatprep.subr.bf16.mxu0 %v2067_v17  ;;  %v2079_v35 = vpack.c.bf16 %v271_v33, %v269_v32  ;;  %v270_v37 = vld [vmem:[#allocation4 + $0xb0] sm:$0xff]  ;;  %v273_v38 = vld [vmem:[#allocation4 + $0xc8] sm:$0xff]  ;;  %v275_v39 = vld [vmem:[#allocation4 + $0xd8] sm:$0xff] }
  0x32   :  { %v2081_v40 = vpack.c.bf16 %v270_v37, %v268_v36  ;;  %v2083_v41 = vpack.c.bf16 %v275_v39, %v273_v38  ;;  %v272_v42 = vld [vmem:[#allocation4 + $0xc0] sm:$0xff]  ;;  %v274_v43 = vld [vmem:[#allocation4 + $0xd0] sm:$0xff]  ;;  %v277_v45 = vld [vmem:[#allocation4 + $0xe8] sm:$0xff] }
  0x33   :  { %v2788_v44 = vld [vmem:[%s3375_s0 + $0x8] sm:$0xff]  ;;  %v2794_v48 = vld [vmem:[%s3375_s0] sm:$0xff]  ;;  %v2085_v50 = vpack.c.bf16 %v274_v43, %v272_v42  ;;  %v276_v52 = vld [vmem:[#allocation4 + $0xe0] sm:$0xff] }
  0x34   :  { %2070 = vmatpush1.bf16.msra.mxu0 %v2069_v22  ;;  %v279_v46 = vld [vmem:[#allocation4 + $0xf8] sm:$0xff]  ;;  %v100_v47 = vrot.slane %v2788_v44, 7  ;;  %v99_v49 = vrot.slane %v2794_v48, 7  ;;  %v278_v53 = vld [vmem:[#allocation4 + $0xf0] sm:$0xff]  ;;  %v281_v54 = vld [vmem:[#allocation4 + $0x108] sm:$0xff] }
  0x35   :  { %2072 = vmatprep.subr.bf16.mxu0 %v2071_v23  ;;  %v2087_v51 = vpack.c.bf16 %v279_v46, %v277_v45  ;;  %v283_v55 = vld [vmem:[#allocation4 + $0x118] sm:$0xff]  ;;  %v2089_v56 = vpack.c.bf16 %v278_v53, %v276_v52  ;;  %v280_v58 = vld [vmem:[#allocation4 + $0x100] sm:$0xff]  ;;  %v282_v59 = vld [vmem:[#allocation4 + $0x110] sm:$0xff] }
  0x36   :  { %112 = vst [vmem:[#allocation2 + $0x8] sm:$0xfe] %v100_v47  ;;  %111 = vst [vmem:[#allocation2] sm:$0xfe] %v99_v49  ;;  %v2091_v57 = vpack.c.bf16 %v283_v55, %v281_v54  ;;  %v285_v60 = vld [vmem:[#allocation4 + $0x128] sm:$0xff]  ;;  %v287_v61 = vld [vmem:[#allocation4 + $0x138] sm:$0xff]  ;;  %v2093_v63 = vpack.c.bf16 %v282_v59, %v280_v58 }
  0x37   :  { %v2095_v0 = vpack.c.bf16 %v287_v61, %v285_v60  ;;  %v284_v3 = vld [vmem:[#allocation4 + $0x120] sm:$0xff]  ;;  %v286_v4 = vld [vmem:[#allocation4 + $0x130] sm:$0xff]  ;;  %v289_v5 = vld [vmem:[#allocation4 + $0x148] sm:$0xff] }
  0x38   :  { %2074 = vmatpush1.bf16.msra.mxu0 %v2073_v28  ;;  %v291_v6 = vld [vmem:[#allocation4 + $0x158] sm:$0xff]  ;;  %v2097_v7 = vpack.c.bf16 %v286_v4, %v284_v3  ;;  %v288_v9 = vld [vmem:[#allocation4 + $0x140] sm:$0xff]  ;;  %v290_v10 = vld [vmem:[#allocation4 + $0x150] sm:$0xff] }
  0x39   :  { %2076 = vmatprep.subr.bf16.mxu0 %v2075_v29  ;;  %v2099_v8 = vpack.c.bf16 %v291_v6, %v289_v5  ;;  %v293_v11 = vld [vmem:[#allocation4 + $0x168] sm:$0xff]  ;;  %v295_v12 = vld [vmem:[#allocation4 + $0x178] sm:$0xff]  ;;  %v2101_v13 = vpack.c.bf16 %v290_v10, %v288_v9  ;;  %v292_v14 = vld [vmem:[#allocation4 + $0x160] sm:$0xff] }
  0x3a   :  { %v2804_v15 = vld [vmem:[%s3375_s0 + $0x18] sm:$0xff]  ;;  %v2103_v16 = vpack.c.bf16 %v295_v12, %v293_v11  ;;  %v294_v17 = vld [vmem:[#allocation4 + $0x170] sm:$0xff]  ;;  %v2810_v20 = vld [vmem:[%s3375_s0 + $0x10] sm:$0xff] }
  0x3b   :  { %v297_v18 = vld [vmem:[#allocation4 + $0x188] sm:$0xff]  ;;  %v103_v19 = vrot.slane %v2804_v15, 7  ;;  %v299_v21 = vld [vmem:[#allocation4 + $0x198] sm:$0xff]  ;;  %v101_v22 = vrot.slane %v2810_v20, 7  ;;  %v2105_v29 = vpack.c.bf16 %v294_v17, %v292_v14  ;;  %v296_v32 = vld [vmem:[#allocation4 + $0x180] sm:$0xff] }
  0x3c   :  { %2078 = vmatpush1.bf16.msra.mxu0 %v2077_v34  ;;  %v2816_v23 = vld [vmem:[%s3375_s0 + $0x28] sm:$0xff]  ;;  %v2821_v24 = vld [vmem:[%s3375_s0 + $0x38] sm:$0xff]  ;;  %v2830_v27 = vld [vmem:[%s3375_s0 + $0x20] sm:$0xff]  ;;  %v2107_v31 = vpack.c.bf16 %v299_v21, %v297_v18 }
  0x3d   :  { %2080 = vmatprep.subr.bf16.mxu0 %v2079_v35  ;;  %v141_v62 = vld [vmem:[#allocation2 + $0x8] sm:$0xff]  ;;  %116 = vst [vmem:[#allocation2 + $0x28] sm:$0x1] %v103_v19  ;;  %v123_v25 = vrot.slane %v2816_v23, 6  ;;  %v126_v26 = vrot.slane %v2821_v24, 6  ;;  %v2835_v28 = vld [vmem:[%s3375_s0 + $0x30] sm:$0xff]  ;;  %v2849_v10 = vsel %vm98_vm2, %v100_v47, %v103_v19  ;;  %v2861_v47 = vsel %vm98_vm2, %v99_v49, %v101_v22 }
  0x3e   :  { %516 = vmatprep.mubr.f32.mxu0 %v141_v62  ;;  %115 = vst [vmem:[#allocation2 + $0x20] sm:$0x1] %v101_v22  ;;  %v122_v30 = vrot.slane %v2830_v27, 6  ;;  %v298_v33 = vld [vmem:[#allocation4 + $0x190] sm:$0xff]  ;;  %v124_v34 = vrot.slane %v2835_v28, 6  ;;  %v301_v35 = vld [vmem:[#allocation4 + $0x1a8] sm:$0xff] }
  0x3f   :  { %135 = vst [vmem:[#allocation2 + $0x28] sm:$0xfc] %v123_v25  ;;  %139 = vst [vmem:[#allocation2 + $0x48] sm:$0x3] %v126_v26  ;;  %v303_v36 = vld [vmem:[#allocation4 + $0x1b8] sm:$0xff]  ;;  %v2109_v37 = vpack.c.bf16 %v298_v33, %v296_v32  ;;  %v300_v39 = vld [vmem:[#allocation4 + $0x1a0] sm:$0xff]  ;;  %v2842_v3 = vsel %vm121_vm1, %v123_v25, %v126_v26 }
  0x40   :  { %2082 = vmatpush1.bf16.msra.mxu0 %v2081_v40  ;;  %134 = vst [vmem:[#allocation2 + $0x20] sm:$0xfc] %v122_v30  ;;  %138 = vst [vmem:[#allocation2 + $0x40] sm:$0x3] %v124_v34  ;;  %v2111_v38 = vpack.c.bf16 %v303_v36, %v301_v35  ;;  %v302_v40 = vld [vmem:[#allocation4 + $0x1b0] sm:$0xff]  ;;  %v307_v42 = vld [vmem:[#allocation4 + $0x1d8] sm:$0xff] }
  0x41   :  { %2084 = vmatprep.subr.bf16.mxu0 %v2083_v41  ;;  %v305_v41 = vld [vmem:[#allocation4 + $0x1c8] sm:$0xff]  ;;  %v2113_v43 = vpack.c.bf16 %v302_v40, %v300_v39  ;;  %v304_v46 = vld [vmem:[#allocation4 + $0x1c0] sm:$0xff]  ;;  %v311_v52 = vld [vmem:[#allocation4 + $0x1f8] sm:$0xff]  ;;  %v210_v12 = vrot.slane %v2842_v3, 1 }
  0x42   :  { %v2115_v45 = vpack.c.bf16 %v307_v42, %v305_v41  ;;  %v308_v55 = vld [vmem:[#allocation4 + $0x1e0] sm:$0xff]  ;;  %v315_v58 = vld [vmem:[#allocation4 + $0x218] sm:$0xff]  ;;  %v314_v62 = vld [vmem:[#allocation4 + $0x210] sm:$0xff] }
  0x43   :  { %v312_v60 = vld [vmem:[#allocation4 + $0x200] sm:$0xff]  ;;  %v140_v5 = vld [vmem:[#allocation2] sm:$0xff]  ;;  %v323_v17 = vld [vmem:[#allocation4 + $0x258] sm:$0xff] }
  0x44   :  { %2086 = vmatpush1.bf16.msra.mxu0 %v2085_v50  ;;  %v306_v50 = vld [vmem:[#allocation4 + $0x1d0] sm:$0xff]  ;;  %v2125_v6 = vpack.c.bf16 %v314_v62, %v312_v60  ;;  %v327_v35 = vld [vmem:[#allocation4 + $0x278] sm:$0xff]  ;;  %v329_v41 = vld [vmem:[#allocation4 + $0x288] sm:$0xff] }
  0x45   :  { %2088 = vmatprep.subr.bf16.mxu0 %v2087_v51  ;;  %v309_v51 = vld [vmem:[#allocation4 + $0x1e8] sm:$0xff]  ;;  %v2117_v53 = vpack.c.bf16 %v306_v50, %v304_v46  ;;  %v318_v9 = vld [vmem:[#allocation4 + $0x230] sm:$0xff]  ;;  %v331_v42 = vld [vmem:[#allocation4 + $0x298] sm:$0xff] }
  0x46   :  { %v2119_v54 = vpack.c.bf16 %v311_v52, %v309_v51  ;;  %v170_v4 = vld [vmem:[#allocation2 + $0x28] sm:$0xfe]  ;;  %v174_v18 = vld [vmem:[#allocation2 + $0x48] sm:$0x1]  ;;  %v2139_v46 = vpack.c.bf16 %v331_v42, %v329_v41  ;;  %v328_v50 = vld [vmem:[#allocation4 + $0x280] sm:$0xff] }
  0x47   :  { %v209_v11 = vrot.slane %v170_v4, 1  ;;  %v169_v14 = vld [vmem:[#allocation2 + $0x20] sm:$0xfe]  ;;  %v226_v32 = vrot.slane %v174_v18, 1  ;;  %v173_v33 = vld [vmem:[#allocation2 + $0x40] sm:$0x1] }
  0x48   :  { %2090 = vmatpush1.bf16.msra.mxu0 %v2089_v56  ;;  %v310_v56 = vld [vmem:[#allocation4 + $0x1f0] sm:$0xff]  ;;  %v206_v19 = vrot.slane %v169_v14, 1  ;;  %v224_v22 = vrot.slane %v173_v33, 1  ;;  %v333_v52 = vld [vmem:[#allocation4 + $0x2a8] sm:$0xff]  ;;  %v893_v18 = vld [vmem:[#allocation6 + $0x40] sm:$0xff] }
  0x49   :  { %2092 = vmatprep.subr.bf16.mxu0 %v2091_v57  ;;  %v313_v57 = vld [vmem:[#allocation4 + $0x208] sm:$0xff]  ;;  %v2121_v59 = vpack.c.bf16 %v310_v56, %v308_v55  ;;  %v326_v39 = vld [vmem:[#allocation4 + $0x270] sm:$0xff]  ;;  %v227_v40 = vsel %vm205_vm3, %v210_v12, %v226_v32  ;;  %v347_v41 = vld [vmem:[#allocation4 + $0x318] sm:$0xff] }
  0x4a   :  { %v2123_v61 = vpack.c.bf16 %v315_v58, %v313_v57  ;;  %v330_v51 = vld [vmem:[#allocation4 + $0x290] sm:$0xff]  ;;  %v886_v56 = vld [vmem:[#allocation6 + $0x8] sm:$0xff]  ;;  %v888_v57 = vld [vmem:[#allocation6 + $0x18] sm:$0xff] }
  0x4b   :  { %v334_v55 = vld [vmem:[#allocation4 + $0x2b0] sm:$0xff]  ;;  %v885_v58 = vld [vmem:[#allocation6] sm:$0xff]  ;;  %v2251_v60 = vpack.c.bf16 %v888_v57, %v886_v56  ;;  %v890_v62 = vld [vmem:[#allocation6 + $0x28] sm:$0xff] }
  0x4c   :  { %2094 = vmatpush1.bf16.msra.mxu0 %v2093_v63  ;;  %v317_v63 = vld [vmem:[#allocation4 + $0x228] sm:$0xff]  ;;  %v351_v57 = vld [vmem:[#allocation4 + $0x338] sm:$0xff] }
  0x4d   :  { %2096 = vmatprep.subr.bf16.mxu0 %v2095_v0  ;;  %v319_v0 = vld [vmem:[#allocation4 + $0x238] sm:$0xff]  ;;  %2252 = vmatprep.subr.bf16.mxu1 %v2251_v60  ;;  %v349_v56 = vld [vmem:[#allocation4 + $0x328] sm:$0xff]  ;;  %v348_v60 = vld [vmem:[#allocation4 + $0x320] sm:$0xff] }
  0x50   :  { %2098 = vmatpush1.bf16.msra.mxu0 %v2097_v7  ;;  %v2127_v7 = vpack.c.bf16 %v319_v0, %v317_v63  ;;  %v892_v63 = vld [vmem:[#allocation6 + $0x38] sm:$0xff] }
  0x51   :  { %2100 = vmatprep.subr.bf16.mxu0 %v2099_v8  ;;  %v316_v8 = vld [vmem:[#allocation4 + $0x220] sm:$0xff] }
  0x52   :  { %v2129_v21 = vpack.c.bf16 %v318_v9, %v316_v8  ;;  %v894_v8 = vld [vmem:[#allocation6 + $0x48] sm:$0xff] }
  0x53   :  { %v337_v9 = vld [vmem:[#allocation4 + $0x2c8] sm:$0xff] }
  0x54   :  { %2102 = vmatpush1.bf16.msra.mxu0 %v2101_v13  ;;  %v2853_v13 = vsel %vm121_vm1, %v122_v30, %v124_v34  ;;  %v322_v30 = vld [vmem:[#allocation4 + $0x250] sm:$0xff]  ;;  %v325_v34 = vld [vmem:[#allocation4 + $0x268] sm:$0xff] }
  0x55   :  { %2104 = vmatprep.subr.bf16.mxu0 %v2103_v16  ;;  %v321_v16 = vld [vmem:[#allocation4 + $0x248] sm:$0xff]  ;;  %v207_v25 = vrot.slane %v2853_v13, 1 }
  0x56   :  { %v2131_v26 = vpack.c.bf16 %v323_v17, %v321_v16 }
  0x57   :  { %v208_v49 = vsel %vm205_vm3, %v206_v19, %v207_v25 }
  0x58   :  { %2106 = vmatpush1.bf16.msra.mxu0 %v2105_v29  ;;  %v320_v29 = vld [vmem:[#allocation4 + $0x240] sm:$0xff] }
  0x59   :  { %2108 = vmatprep.subr.bf16.mxu0 %v2107_v31  ;;  %v211_v31 = vsel %vm205_vm3, %v209_v11, %v210_v12  ;;  %v2133_v36 = vpack.c.bf16 %v322_v30, %v320_v29  ;;  %v339_v11 = vld [vmem:[#allocation4 + $0x2d8] sm:$0xff]  ;;  %v341_v30 = vld [vmem:[#allocation4 + $0x2e8] sm:$0xff] }
  0x5a   :  { %v896_v12 = vld [vmem:[#allocation6 + $0x58] sm:$0xff]  ;;  %v2147_v19 = vpack.c.bf16 %v339_v11, %v337_v9 }
  0x5b   :  { %v2259_v17 = vpack.c.bf16 %v896_v12, %v894_v8  ;;  %v900_v29 = vld [vmem:[#allocation6 + $0x78] sm:$0xff]  ;;  %v352_v12 = vld [vmem:[#allocation4 + $0x340] sm:$0xff] }
  0x5c   :  { %2110 = vmatpush1.bf16.msra.mxu0 %v2109_v37  ;;  %v2135_v37 = vpack.c.bf16 %v327_v35, %v325_v34  ;;  %v340_v34 = vld [vmem:[#allocation4 + $0x2e0] sm:$0xff]  ;;  %v355_v8 = vld [vmem:[#allocation4 + $0x358] sm:$0xff] }
  0x5d   :  { %2112 = vmatprep.subr.bf16.mxu0 %v2111_v38  ;;  %v324_v38 = vld [vmem:[#allocation4 + $0x260] sm:$0xff] }
  0x60   :  { %2114 = vmatpush1.bf16.msra.mxu0 %v2113_v43  ;;  %v2137_v43 = vpack.c.bf16 %v326_v39, %v324_v38  ;;  %v902_v38 = vld [vmem:[#allocation6 + $0x88] sm:$0xff]  ;;  %v904_v39 = vld [vmem:[#allocation6 + $0x98] sm:$0xff] }
  0x61   :  { %2116 = vmatprep.subr.bf16.mxu0 %v2115_v45  ;;  %v225_v45 = vsel %vm205_vm3, %v207_v25, %v224_v22  ;;  %v338_v25 = vld [vmem:[#allocation4 + $0x2d0] sm:$0xff] }
  0x64   :  { %2118 = vmatpush1.bf16.msra.mxu0 %v2117_v53  ;;  %v335_v53 = vld [vmem:[#allocation4 + $0x2b8] sm:$0xff] }
  0x65   :  { %2120 = vmatprep.subr.bf16.mxu0 %v2119_v54  ;;  %v332_v54 = vld [vmem:[#allocation4 + $0x2a0] sm:$0xff]  ;;  %v2143_v0 = vpack.c.bf16 %v335_v53, %v333_v52  ;;  %v346_v53 = vld [vmem:[#allocation4 + $0x310] sm:$0xff] }
  0x66   :  { %v2145_v16 = vpack.c.bf16 %v334_v55, %v332_v54  ;;  %v906_v54 = vld [vmem:[#allocation6 + $0xa8] sm:$0xff]  ;;  %v908_v55 = vld [vmem:[#allocation6 + $0xb8] sm:$0xff] }
  0x68   :  { %2122 = vmatpush1.bf16.msra.mxu0 %v2121_v59  ;;  %v2141_v59 = vpack.c.bf16 %v330_v51, %v328_v50  ;;  %v901_v50 = vld [vmem:[#allocation6 + $0x80] sm:$0xff]  ;;  %v903_v51 = vld [vmem:[#allocation6 + $0x90] sm:$0xff] }
  0x69   :  { %2124 = vmatprep.subr.bf16.mxu0 %v2123_v61  ;;  %v887_v61 = vld [vmem:[#allocation6 + $0x10] sm:$0xff] }
  0x6a   :  { %v2253_v4 = vpack.c.bf16 %v887_v61, %v885_v58  ;;  %v2269_v58 = vpack.c.bf16 %v903_v51, %v901_v50  ;;  %v2271_v61 = vpack.c.bf16 %v908_v55, %v906_v54  ;;  %v362_v50 = vld [vmem:[#allocation4 + $0x390] sm:$0xff]  ;;  %v922_v51 = vld [vmem:[#allocation6 + $0x128] sm:$0xff]  ;;  %v367_v54 = vld [vmem:[#allocation4 + $0x3b8] sm:$0xff] }
  0x6b   :  { %517 = vmatmul.mubr.f32.vlgmr.msra.gmra.mrb[0].mxu0 %v140_v5  ;;  %v2255_v5 = vpack.c.bf16 %v892_v63, %v890_v62  ;;  %v905_v62 = vld [vmem:[#allocation6 + $0xa0] sm:$0xff]  ;;  %v907_v63 = vld [vmem:[#allocation6 + $0xb0] sm:$0xff] }
  0x6c   :  { %2126 = vmatpush1.bf16.msra.mxu0 %v2125_v6  ;;  %522 = vmatprep.mubr.f32.mxu0 %v2849_v10  ;;  %v889_v6 = vld [vmem:[#allocation6 + $0x20] sm:$0xff]  ;;  %v2273_v9 = vpack.c.bf16 %v907_v63, %v905_v62  ;;  %v366_v62 = vld [vmem:[#allocation4 + $0x3b0] sm:$0xff]  ;;  %v926_v63 = vld [vmem:[#allocation6 + $0x148] sm:$0xff] }
  0x6d   :  { %2128 = vmatprep.subr.bf16.mxu0 %v2127_v7  ;;  %v891_v7 = vld [vmem:[#allocation6 + $0x30] sm:$0xff]  ;;  %2254 = vmatpush1.bf16.msra.mxu1 %v2253_v4 }
  0x6e   :  { %v2257_v14 = vpack.c.bf16 %v891_v7, %v889_v6  ;;  %2256 = vmatprep.subr.bf16.mxu1 %v2255_v5  ;;  %v350_v4 = vld [vmem:[#allocation4 + $0x330] sm:$0xff]  ;;  %v910_v5 = vld [vmem:[#allocation6 + $0xc8] sm:$0xff]  ;;  %v912_v6 = vld [vmem:[#allocation6 + $0xd8] sm:$0xff] }
  0x6f   :  { %523 = vmatmul.mubr.f32.gmra.mrb[2].mxu0 %v2861_v47  ;;  %v353_v7 = vld [vmem:[#allocation4 + $0x348] sm:$0xff]  ;;  %v2161_v11 = vpack.c.bf16 %v350_v4, %v348_v60  ;;  %v923_v60 = vld [vmem:[#allocation6 + $0x130] sm:$0xff] }
  0x70   :  { %2130 = vmatpush1.bf16.msra.mxu0 %v2129_v21  ;;  %528 = vmatprep.mubr.f32.mxu0 %v211_v31  ;;  %v895_v21 = vld [vmem:[#allocation6 + $0x50] sm:$0xff]  ;;  %v343_v31 = vld [vmem:[#allocation4 + $0x2f8] sm:$0xff]  ;;  %v369_v4 = vld [vmem:[#allocation4 + $0x3c8] sm:$0xff] }
  0x71   :  { %2132 = vmatprep.subr.bf16.mxu0 %v2131_v26  ;;  %v898_v26 = vld [vmem:[#allocation6 + $0x68] sm:$0xff]  ;;  %2258 = vmatpush1.bf16.msra.mxu1 %v2257_v14  ;;  %v2261_v32 = vpack.c.bf16 %v895_v21, %v893_v18  ;;  %v2151_v22 = vpack.c.bf16 %v343_v31, %v341_v30  ;;  %v2275_v14 = vpack.c.bf16 %v912_v6, %v910_v5  ;;  %v354_v18 = vld [vmem:[#allocation4 + $0x350] sm:$0xff]  ;;  %v356_v31 = vld [vmem:[#allocation4 + $0x360] sm:$0xff] }
  0x72   :  { %2260 = vmatprep.subr.bf16.mxu1 %v2259_v17  ;;  %v2263_v35 = vpack.c.bf16 %v900_v29, %v898_v26  ;;  %v2163_v17 = vpack.c.bf16 %v355_v8, %v353_v7  ;;  %v914_v21 = vld [vmem:[#allocation6 + $0xe8] sm:$0xff]  ;;  %v359_v26 = vld [vmem:[#allocation4 + $0x378] sm:$0xff]  ;;  %v2165_v30 = vpack.c.bf16 %v354_v18, %v352_v12  ;;  %v368_v8 = vld [vmem:[#allocation4 + $0x3c0] sm:$0xff] }
  0x73   :  { %529 = vmatmul.mubr.f32.gmra.mrb[4].mxu0 %v208_v49  ;;  %v899_v49 = vld [vmem:[#allocation6 + $0x70] sm:$0xff]  ;;  %v371_v5 = vld [vmem:[#allocation4 + $0x3d8] sm:$0xff]  ;;  %v373_v18 = vld [vmem:[#allocation4 + $0x3e8] sm:$0xff] }
  0x74   :  { %2134 = vmatpush1.bf16.msra.mxu0 %v2133_v36  ;;  %534 = vmatprep.mubr.f32.mxu0 %v227_v40  ;;  %v897_v36 = vld [vmem:[#allocation6 + $0x60] sm:$0xff]  ;;  %v345_v40 = vld [vmem:[#allocation4 + $0x308] sm:$0xff]  ;;  %v927_v12 = vld [vmem:[#allocation6 + $0x150] sm:$0xff] }
  0x75   :  { %2136 = vmatprep.subr.bf16.mxu0 %v2135_v37  ;;  %v342_v37 = vld [vmem:[#allocation4 + $0x2f0] sm:$0xff]  ;;  %2262 = vmatpush1.bf16.msra.mxu1 %v2261_v32  ;;  %v2265_v42 = vpack.c.bf16 %v899_v49, %v897_v36  ;;  %v2155_v52 = vpack.c.bf16 %v347_v41, %v345_v40  ;;  %v918_v49 = vld [vmem:[#allocation6 + $0x108] sm:$0xff]  ;;  %v360_v41 = vld [vmem:[#allocation4 + $0x380] sm:$0xff] }
  0x76   :  { %2264 = vmatprep.subr.bf16.mxu1 %v2263_v35  ;;  %v358_v36 = vld [vmem:[#allocation4 + $0x370] sm:$0xff] }
  0x77   :  { %535 = vmatmul.mubr.f32.gmra.mrb[6].mxu0 %v225_v45  ;;  %v344_v45 = vld [vmem:[#allocation4 + $0x300] sm:$0xff]  ;;  %v2169_v40 = vpack.c.bf16 %v358_v36, %v356_v31  ;;  %v180_v36 = vrot.slane %v2816_v23, 7 }
  0x78   :  { %2138 = vmatpush1.bf16.msra.mxu0 %v2137_v43  ;;  %605 = vmatprep.mubr.f32.mxu0 %v2788_v44  ;;  %v336_v44 = vld [vmem:[#allocation4 + $0x2c0] sm:$0xff]  ;;  %v2153_v43 = vpack.c.bf16 %v342_v37, %v340_v34  ;;  %v915_v34 = vld [vmem:[#allocation6 + $0xf0] sm:$0xff]  ;;  %v361_v37 = vld [vmem:[#allocation4 + $0x388] sm:$0xff] }
  0x79   :  { %2140 = vmatprep.subr.bf16.mxu0 %v2139_v46  ;;  %v2149_v33 = vpack.c.bf16 %v338_v25, %v336_v44  ;;  %v2267_v46 = vpack.c.bf16 %v904_v39, %v902_v38  ;;  %2266 = vmatpush1.bf16.msra.mxu1 %v2265_v42  ;;  %v911_v44 = vld [vmem:[#allocation6 + $0xd0] sm:$0xff]  ;;  %v357_v25 = vld [vmem:[#allocation4 + $0x368] sm:$0xff]  ;;  %v363_v38 = vld [vmem:[#allocation4 + $0x398] sm:$0xff] }
  0x7a   :  { %v2167_v35 = vpack.c.bf16 %v359_v26, %v357_v25 }
  0x7b   :  { %2268 = vmatprep.subr.bf16.mxu1 %v2267_v46  ;;  %v2171_v46 = vpack.c.bf16 %v363_v38, %v361_v37 }
  0x7c   :  { %2142 = vmatpush1.bf16.msra.mxu0 %v2141_v59  ;;  %v2157_v59 = vpack.c.bf16 %v346_v53, %v344_v45  ;;  %v919_v45 = vld [vmem:[#allocation6 + $0x110] sm:$0xff]  ;;  %v365_v53 = vld [vmem:[#allocation4 + $0x3a8] sm:$0xff] }
  0x7d   :  { %2144 = vmatprep.subr.bf16.mxu0 %v2143_v0  ;;  %v2159_v0 = vpack.c.bf16 %v351_v57, %v349_v56  ;;  %2270 = vmatpush1.bf16.msra.mxu1 %v2269_v58  ;;  %v2173_v56 = vpack.c.bf16 %v362_v50, %v360_v41  ;;  %v364_v57 = vld [vmem:[#allocation4 + $0x3a0] sm:$0xff]  ;;  %v179_v41 = vrot.slane %v2830_v27, 7 }
  0x7e   :  { %2272 = vmatprep.subr.bf16.mxu1 %v2271_v61  ;;  %v2175_v61 = vpack.c.bf16 %v367_v54, %v365_v53  ;;  %v2177_v7 = vpack.c.bf16 %v366_v62, %v364_v57  ;;  %v380_v50 = vld [vmem:[#allocation4 + $0x420] sm:$0xff] }
  0x80   :  { %2146 = vmatpush1.bf16.msra.mxu0 %v2145_v16  ;;  %v909_v16 = vld [vmem:[#allocation6 + $0xc0] sm:$0xff] }
  0x81   :  { %2148 = vmatprep.subr.bf16.mxu0 %v2147_v19  ;;  %v916_v19 = vld [vmem:[#allocation6 + $0xf8] sm:$0xff]  ;;  %2274 = vmatpush1.bf16.msra.mxu1 %v2273_v9  ;;  %v2277_v29 = vpack.c.bf16 %v911_v44, %v909_v16  ;;  %v370_v16 = vld [vmem:[#allocation4 + $0x3d0] sm:$0xff]  ;;  %v930_v44 = vld [vmem:[#allocation6 + $0x168] sm:$0xff] }
  0x82   :  { %2276 = vmatprep.subr.bf16.mxu1 %v2275_v14  ;;  %v2279_v32 = vpack.c.bf16 %v916_v19, %v914_v21  ;;  %v2179_v14 = vpack.c.bf16 %v371_v5, %v369_v4  ;;  %v375_v21 = vld [vmem:[#allocation4 + $0x3f8] sm:$0xff]  ;;  %v2181_v25 = vpack.c.bf16 %v370_v16, %v368_v8  ;;  %v388_v8 = vld [vmem:[#allocation4 + $0x460] sm:$0xff] }
  0x83   :  { %v2183_v31 = vpack.c.bf16 %v375_v21, %v373_v18  ;;  %v145_v4 = vld [vmem:[#allocation2 + $0x8] sm:$0xfc]  ;;  %v392_v18 = vld [vmem:[#allocation4 + $0x480] sm:$0xff]  ;;  %v394_v21 = vld [vmem:[#allocation4 + $0x490] sm:$0xff] }
  0x84   :  { %2150 = vmatpush1.bf16.msra.mxu0 %v2149_v33  ;;  %v913_v33 = vld [vmem:[#allocation6 + $0xe0] sm:$0xff]  ;;  %v395_v16 = vld [vmem:[#allocation4 + $0x498] sm:$0xff] }
  0x85   :  { %2152 = vmatprep.subr.bf16.mxu0 %v2151_v22  ;;  %v920_v22 = vld [vmem:[#allocation6 + $0x118] sm:$0xff]  ;;  %2278 = vmatpush1.bf16.msra.mxu1 %v2277_v29  ;;  %v2281_v39 = vpack.c.bf16 %v915_v34, %v913_v33  ;;  %v929_v29 = vld [vmem:[#allocation6 + $0x160] sm:$0xff]  ;;  %v374_v33 = vld [vmem:[#allocation4 + $0x3f0] sm:$0xff] }
  0x86   :  { %2280 = vmatprep.subr.bf16.mxu1 %v2279_v32  ;;  %v2283_v42 = vpack.c.bf16 %v920_v22, %v918_v49  ;;  %v372_v32 = vld [vmem:[#allocation4 + $0x3e0] sm:$0xff]  ;;  %v377_v34 = vld [vmem:[#allocation4 + $0x408] sm:$0xff]  ;;  %v183_v49 = vrot.slane %v2821_v24, 7 }
  0x87   :  { %v2185_v37 = vpack.c.bf16 %v374_v33, %v372_v32  ;;  %v398_v32 = vld [vmem:[#allocation4 + $0x4b0] sm:$0xff]  ;;  %v401_v33 = vld [vmem:[#allocation4 + $0x4c8] sm:$0xff] }
  0x88   :  { %2154 = vmatpush1.bf16.msra.mxu0 %v2153_v43  ;;  %v917_v43 = vld [vmem:[#allocation6 + $0x100] sm:$0xff]  ;;  %v230_v62 = vrot.slane %v183_v49, 1 }
  0x89   :  { %2156 = vmatprep.subr.bf16.mxu0 %v2155_v52  ;;  %v924_v52 = vld [vmem:[#allocation6 + $0x138] sm:$0xff]  ;;  %2282 = vmatpush1.bf16.msra.mxu1 %v2281_v39  ;;  %v2285_v55 = vpack.c.bf16 %v919_v45, %v917_v43  ;;  %v376_v39 = vld [vmem:[#allocation4 + $0x400] sm:$0xff]  ;;  %v381_v43 = vld [vmem:[#allocation4 + $0x428] sm:$0xff] }
  0x8a   :  { %2284 = vmatprep.subr.bf16.mxu1 %v2283_v42  ;;  %v2287_v58 = vpack.c.bf16 %v924_v52, %v922_v51  ;;  %v181_v42 = vrot.slane %v2835_v28, 7  ;;  %v383_v45 = vld [vmem:[#allocation4 + $0x438] sm:$0xff]  ;;  %v382_v51 = vld [vmem:[#allocation4 + $0x430] sm:$0xff]  ;;  %v215_v52 = vrot.slane %v180_v36, 1  ;;  %v212_v28 = vrot.slane %v179_v41, 1 }
  0x8b   :  { %v2191_v24 = vpack.c.bf16 %v383_v45, %v381_v43  ;;  %v2193_v27 = vpack.c.bf16 %v382_v51, %v380_v50  ;;  %v409_v43 = vld [vmem:[#allocation4 + $0x508] sm:$0xff]  ;;  %v411_v45 = vld [vmem:[#allocation4 + $0x518] sm:$0xff]  ;;  %v410_v50 = vld [vmem:[#allocation4 + $0x510] sm:$0xff] }
  0x8c   :  { %2158 = vmatpush1.bf16.msra.mxu0 %v2157_v59  ;;  %v921_v59 = vld [vmem:[#allocation6 + $0x120] sm:$0xff]  ;;  %v182_v54 = vsel %vm98_vm2, %v179_v41, %v181_v42  ;;  %v413_v51 = vld [vmem:[#allocation4 + $0x528] sm:$0xff] }
  0x8d   :  { %2160 = vmatprep.subr.bf16.mxu0 %v2159_v0  ;;  %v928_v0 = vld [vmem:[#allocation6 + $0x158] sm:$0xff]  ;;  %2286 = vmatpush1.bf16.msra.mxu1 %v2285_v55  ;;  %v2289_v6 = vpack.c.bf16 %v923_v60, %v921_v59  ;;  %v385_v55 = vld [vmem:[#allocation4 + $0x448] sm:$0xff]  ;;  %v213_v57 = vrot.slane %v182_v54, 1  ;;  %v384_v59 = vld [vmem:[#allocation4 + $0x440] sm:$0xff] }
  0x8e   :  { %2288 = vmatprep.subr.bf16.mxu1 %v2287_v58  ;;  %v2291_v9 = vpack.c.bf16 %v928_v0, %v926_v63  ;;  %v386_v60 = vld [vmem:[#allocation4 + $0x450] sm:$0xff]  ;;  %v389_v63 = vld [vmem:[#allocation4 + $0x468] sm:$0xff]  ;;  %v391_v0 = vld [vmem:[#allocation4 + $0x478] sm:$0xff] }
  0x8f   :  { %v214_v5 = vsel %vm205_vm3, %v212_v28, %v213_v57  ;;  %v404_v41 = vld [vmem:[#allocation4 + $0x4e0] sm:$0xff]  ;;  %v419_v28 = vld [vmem:[#allocation4 + $0x558] sm:$0xff] }
  0x90   :  { %2162 = vmatpush1.bf16.msra.mxu0 %v2161_v11  ;;  %v925_v11 = vld [vmem:[#allocation6 + $0x140] sm:$0xff] }
  0x91   :  { %2164 = vmatprep.subr.bf16.mxu0 %v2163_v17  ;;  %v932_v17 = vld [vmem:[#allocation6 + $0x178] sm:$0xff]  ;;  %2290 = vmatpush1.bf16.msra.mxu1 %v2289_v6  ;;  %v2293_v19 = vpack.c.bf16 %v927_v12, %v925_v11  ;;  %v159_v6 = vrot.slane %v2849_v10, 2  ;;  %v158_v12 = vrot.slane %v145_v4, 2  ;;  %v420_v4 = vld [vmem:[#allocation4 + $0x560] sm:$0xff] }
  0x92   :  { %2292 = vmatprep.subr.bf16.mxu1 %v2291_v9  ;;  %v2295_v26 = vpack.c.bf16 %v932_v17, %v930_v44  ;;  %v390_v9 = vld [vmem:[#allocation4 + $0x470] sm:$0xff] }
  0x94   :  { %2166 = vmatpush1.bf16.msra.mxu0 %v2165_v30  ;;  %v931_v30 = vld [vmem:[#allocation6 + $0x170] sm:$0xff] }
  0x95   :  { %2168 = vmatprep.subr.bf16.mxu0 %v2167_v35  ;;  %v379_v35 = vld [vmem:[#allocation4 + $0x418] sm:$0xff]  ;;  %2294 = vmatpush1.bf16.msra.mxu1 %v2293_v19  ;;  %v2297_v22 = vpack.c.bf16 %v931_v30, %v929_v29  ;;  %v160_v19 = vsel %vm154_vm4, %v158_v12, %v159_v6  ;;  %v2205_v29 = vpack.c.bf16 %v394_v21, %v392_v18  ;;  %v429_v12 = vld [vmem:[#allocation4 + $0x5a8] sm:$0xff] }
  0x96   :  { %2296 = vmatprep.subr.bf16.mxu1 %v2295_v26  ;;  %v2187_v38 = vpack.c.bf16 %v379_v35, %v377_v34  ;;  %v399_v26 = vld [vmem:[#allocation4 + $0x4b8] sm:$0xff]  ;;  %v433_v18 = vld [vmem:[#allocation4 + $0x5c8] sm:$0xff] }
  0x97   :  { %v403_v34 = vld [vmem:[#allocation4 + $0x4d8] sm:$0xff] }
  0x98   :  { %2170 = vmatpush1.bf16.msra.mxu0 %v2169_v40  ;;  %v378_v40 = vld [vmem:[#allocation4 + $0x410] sm:$0xff]  ;;  %v435_v21 = vld [vmem:[#allocation4 + $0x5d8] sm:$0xff] }
  0x99   :  { %2172 = vmatprep.subr.bf16.mxu0 %v2171_v46  ;;  %v184_v46 = vsel %vm98_vm2, %v180_v36, %v183_v49  ;;  %2298 = vmatpush1.bf16.msra.mxu1 %v2297_v22  ;;  %v2189_v23 = vpack.c.bf16 %v378_v40, %v376_v39  ;;  %v2211_v36 = vpack.c.bf16 %v403_v34, %v401_v33  ;;  %v400_v49 = vld [vmem:[#allocation4 + $0x4c0] sm:$0xff]  ;;  %v402_v22 = vld [vmem:[#allocation4 + $0x4d0] sm:$0xff] }
  0x9a   :  { %v216_v53 = vrot.slane %v184_v46, 1  ;;  %v2213_v39 = vpack.c.bf16 %v402_v22, %v400_v49  ;;  %v178_v33 = vld [vmem:[#allocation2 + $0x48] sm:$0x7] }
  0x9b   :  { %v438_v22 = vld [vmem:[#allocation4 + $0x5f0] sm:$0xff] }
  0x9c   :  { %2174 = vmatpush1.bf16.msra.mxu0 %v2173_v56  ;;  %v387_v56 = vld [vmem:[#allocation4 + $0x458] sm:$0xff]  ;;  %v231_v11 = vsel %vm205_vm3, %v216_v53, %v230_v62 }
  0x9d   :  { %2176 = vmatprep.subr.bf16.mxu0 %v2175_v61  ;;  %v2195_v58 = vpack.c.bf16 %v387_v56, %v385_v55  ;;  %v217_v61 = vsel %vm205_vm3, %v215_v52, %v216_v53  ;;  %v415_v52 = vld [vmem:[#allocation4 + $0x538] sm:$0xff]  ;;  %v412_v55 = vld [vmem:[#allocation4 + $0x520] sm:$0xff]  ;;  %v414_v56 = vld [vmem:[#allocation4 + $0x530] sm:$0xff] }
  0x9e   :  { %v2223_v54 = vpack.c.bf16 %v415_v52, %v413_v51  ;;  %v423_v62 = vld [vmem:[#allocation4 + $0x578] sm:$0xff] }
  0xa0   :  { %2178 = vmatpush1.bf16.msra.mxu0 %v2177_v7  ;;  %v2199_v7 = vpack.c.bf16 %v391_v0, %v389_v63 }
  0xa1   :  { %2180 = vmatprep.subr.bf16.mxu0 %v2179_v14  ;;  %v393_v14 = vld [vmem:[#allocation4 + $0x488] sm:$0xff] }
  0xa2   :  { %v2203_v17 = vpack.c.bf16 %v395_v16, %v393_v14  ;;  %v431_v14 = vld [vmem:[#allocation4 + $0x5b8] sm:$0xff] }
  0xa4   :  { %2182 = vmatpush1.bf16.msra.mxu0 %v2181_v25  ;;  %v397_v25 = vld [vmem:[#allocation4 + $0x4a8] sm:$0xff] }
  0xa5   :  { %2184 = vmatprep.subr.bf16.mxu0 %v2183_v31  ;;  %v2207_v30 = vpack.c.bf16 %v399_v26, %v397_v25  ;;  %v396_v31 = vld [vmem:[#allocation4 + $0x4a0] sm:$0xff]  ;;  %v2243_v25 = vpack.c.bf16 %v435_v21, %v433_v18  ;;  %v943_v21 = vld [vmem:[#allocation6 + $0x1d0] sm:$0xff] }
  0xa6   :  { %v2209_v35 = vpack.c.bf16 %v398_v32, %v396_v31  ;;  %v432_v26 = vld [vmem:[#allocation4 + $0x5c0] sm:$0xff]  ;;  %v439_v31 = vld [vmem:[#allocation4 + $0x5f8] sm:$0xff] }
  0xa7   :  { %v176_v32 = vld [vmem:[#allocation2 + $0x28] sm:$0xf8]  ;;  %v941_v18 = vld [vmem:[#allocation6 + $0x1c0] sm:$0xff] }
  0xa8   :  { %2186 = vmatpush1.bf16.msra.mxu0 %v2185_v37  ;;  %v405_v37 = vld [vmem:[#allocation4 + $0x4e8] sm:$0xff] }
  0xa9   :  { %2188 = vmatprep.subr.bf16.mxu0 %v2187_v38  ;;  %v407_v38 = vld [vmem:[#allocation4 + $0x4f8] sm:$0xff] }
  0xaa   :  { %v2215_v40 = vpack.c.bf16 %v407_v38, %v405_v37  ;;  %v144_v37 = vld [vmem:[#allocation2] sm:$0xfc]  ;;  %v147_v38 = vld [vmem:[#allocation2 + $0x28] sm:$0x3] }
  0xab   :  { %606 = vmatmul.mubr.f32.vlgmr.msra.gmra.mrb[0].mxu0 %v2794_v48  ;;  %v2197_v48 = vpack.c.bf16 %v386_v60, %v384_v59  ;;  %v416_v59 = vld [vmem:[#allocation4 + $0x540] sm:$0xff]  ;;  %v418_v60 = vld [vmem:[#allocation4 + $0x550] sm:$0xff] }
  0xac   :  { %2190 = vmatpush1.bf16.msra.mxu0 %v2189_v23  ;;  %611 = vmatprep.mubr.f32.mxu0 %v2804_v15  ;;  %v228_v15 = vrot.slane %v181_v42, 1  ;;  %v406_v42 = vld [vmem:[#allocation4 + $0x4f0] sm:$0xff]  ;;  %v2219_v23 = vpack.c.bf16 %v411_v45, %v409_v43  ;;  %v2229_v63 = vpack.c.bf16 %v418_v60, %v416_v59  ;;  %v156_v43 = vrot.slane %v2861_v47, 2 }
  0xad   :  { %2192 = vmatprep.subr.bf16.mxu0 %v2191_v24  ;;  %v2217_v46 = vpack.c.bf16 %v406_v42, %v404_v41  ;;  %v408_v24 = vld [vmem:[#allocation4 + $0x500] sm:$0xff]  ;;  %v175_v41 = vld [vmem:[#allocation2 + $0x20] sm:$0xf8]  ;;  %v177_v42 = vld [vmem:[#allocation2 + $0x40] sm:$0x7] }
  0xae   :  { %v229_v44 = vsel %vm205_vm3, %v213_v57, %v228_v15  ;;  %v2221_v53 = vpack.c.bf16 %v410_v50, %v408_v24  ;;  %v2225_v57 = vpack.c.bf16 %v414_v56, %v412_v55  ;;  %v427_v15 = vld [vmem:[#allocation4 + $0x598] sm:$0xff]  ;;  %v192_v24 = vrot.slane %v2853_v13, 2  ;;  %v146_v50 = vld [vmem:[#allocation2 + $0x20] sm:$0x3] }
  0xaf   :  { %612 = vmatmul.mubr.f32.gmra.mrb[2].mxu0 %v2810_v20  ;;  %v2201_v20 = vpack.c.bf16 %v390_v9, %v388_v8  ;;  %v424_v9 = vld [vmem:[#allocation4 + $0x580] sm:$0xff]  ;;  %v197_v51 = vrot.slane %v177_v42, 2  ;;  %v161_v55 = vrot.slane %v146_v50, 2 }
  0xb0   :  { %2194 = vmatpush1.bf16.msra.mxu0 %v2193_v27  ;;  %617 = vmatprep.mubr.f32.mxu0 %v217_v61  ;;  %v417_v27 = vld [vmem:[#allocation4 + $0x548] sm:$0xff] }
  0xb1   :  { %2196 = vmatprep.subr.bf16.mxu0 %v2195_v58  ;;  %v2227_v58 = vpack.c.bf16 %v419_v28, %v417_v27  ;;  %v421_v61 = vld [vmem:[#allocation4 + $0x568] sm:$0xff]  ;;  %v198_v28 = vsel %vm154_vm4, %v192_v24, %v197_v51 }
  0xb2   :  { %v2231_v0 = vpack.c.bf16 %v423_v62, %v421_v61  ;;  %v219_v59 = vrot.slane %v198_v28, 1 }
  0xb3   :  { %618 = vmatmul.mubr.f32.gmra.mrb[4].mxu0 %v214_v5  ;;  %v425_v5 = vld [vmem:[#allocation4 + $0x588] sm:$0xff] }
  0xb4   :  { %2198 = vmatpush1.bf16.msra.mxu0 %v2197_v48  ;;  %623 = vmatprep.mubr.f32.mxu0 %v231_v11  ;;  %v422_v48 = vld [vmem:[#allocation4 + $0x570] sm:$0xff]  ;;  %v2235_v8 = vpack.c.bf16 %v427_v15, %v425_v5  ;;  %v933_v5 = vld [vmem:[#allocation6 + $0x180] sm:$0xff] }
  0xb5   :  { %2200 = vmatprep.subr.bf16.mxu0 %v2199_v7  ;;  %v2233_v7 = vpack.c.bf16 %v422_v48, %v420_v4  ;;  %v426_v11 = vld [vmem:[#allocation4 + $0x590] sm:$0xff]  ;;  %v936_v4 = vld [vmem:[#allocation6 + $0x198] sm:$0xff] }
  0xb6   :  { %v2237_v16 = vpack.c.bf16 %v426_v11, %v424_v9  ;;  %v935_v15 = vld [vmem:[#allocation6 + $0x190] sm:$0xff]  ;;  %v940_v9 = vld [vmem:[#allocation6 + $0x1b8] sm:$0xff] }
  0xb7   :  { %624 = vmatmul.mubr.f32.gmra.mrb[6].mxu0 %v229_v44  ;;  %v428_v44 = vld [vmem:[#allocation4 + $0x5a0] sm:$0xff] }
  0xb8   :  { %2202 = vmatpush1.bf16.msra.mxu0 %v2201_v20  ;;  %694 = vmatprep.mubr.f32.mxu0 %v160_v19  ;;  %v2239_v20 = vpack.c.bf16 %v431_v14, %v429_v12  ;;  %v937_v12 = vld [vmem:[#allocation6 + $0x1a0] sm:$0xff]  ;;  %v939_v14 = vld [vmem:[#allocation6 + $0x1b0] sm:$0xff] }
  0xb9   :  { %2204 = vmatprep.subr.bf16.mxu0 %v2203_v17  ;;  %v430_v17 = vld [vmem:[#allocation4 + $0x5b0] sm:$0xff] }
  0xba   :  { %v2241_v19 = vpack.c.bf16 %v430_v17, %v428_v44  ;;  %v944_v44 = vld [vmem:[#allocation6 + $0x1d8] sm:$0xff] }
  0xbc   :  { %2206 = vmatpush1.bf16.msra.mxu0 %v2205_v29  ;;  %v434_v29 = vld [vmem:[#allocation4 + $0x5d0] sm:$0xff] }
  0xbd   :  { %2208 = vmatprep.subr.bf16.mxu0 %v2207_v30  ;;  %v437_v30 = vld [vmem:[#allocation4 + $0x5e8] sm:$0xff]  ;;  %v2245_v34 = vpack.c.bf16 %v434_v29, %v432_v26  ;;  %v948_v26 = vld [vmem:[#allocation6 + $0x1f8] sm:$0xff] }
  0xbe   :  { %v2247_v49 = vpack.c.bf16 %v439_v31, %v437_v30  ;;  %v945_v30 = vld [vmem:[#allocation6 + $0x1e0] sm:$0xff]  ;;  %v947_v31 = vld [vmem:[#allocation6 + $0x1f0] sm:$0xff] }
  0xc0   :  { %2210 = vmatpush1.bf16.msra.mxu0 %v2209_v35  ;;  %v436_v35 = vld [vmem:[#allocation4 + $0x5e0] sm:$0xff] }
  0xc1   :  { %2212 = vmatprep.subr.bf16.mxu0 %v2211_v36  ;;  %v195_v36 = vrot.slane %v2842_v3, 2  ;;  %v2249_v45 = vpack.c.bf16 %v438_v22, %v436_v35  ;;  %v191_v3 = vrot.slane %v175_v41, 2  ;;  %v440_v22 = vld [vmem:[%s3377_s2] sm:$0x3] }
  0xc3   :  { %v193_v13 = vsel %vm154_vm4, %v191_v3, %v192_v24 }
  0xc4   :  { %2214 = vmatpush1.bf16.msra.mxu0 %v2213_v39  ;;  %v194_v39 = vrot.slane %v176_v32, 2  ;;  %v2313_v32 = vpack.c.bf16 %v947_v31, %v945_v30 }
  0xc5   :  { %2216 = vmatprep.subr.bf16.mxu0 %v2215_v40  ;;  %v199_v40 = vrot.slane %v178_v33, 2  ;;  %v950_v33 = vld [vmem:[#allocation6 + $0x208] sm:$0xff] }
  0xc6   :  { %v196_v52 = vsel %vm154_vm4, %v194_v39, %v195_v36 }
  0xc7   :  { %v221_v56 = vrot.slane %v196_v52, 1  ;;  %v234_v61 = vrot.slane %v199_v40, 1 }
  0xc8   :  { %2218 = vmatpush1.bf16.msra.mxu0 %v2217_v46  ;;  %v155_v46 = vrot.slane %v144_v37, 2 }
  0xc9   :  { %2220 = vmatprep.subr.bf16.mxu0 %v2219_v23  ;;  %v163_v23 = vrot.slane %v147_v38, 2 }
  0xcb   :  { %v164_v47 = vsel %vm154_vm4, %v159_v6, %v163_v23  ;;  %v232_v6 = vrot.slane %v197_v51, 1  ;;  %v2615_v51 = vld [vmem:[%s3375_s0 + $0x8] sm:$0xff] }
  0xcc   :  { %2222 = vmatpush1.bf16.msra.mxu0 %v2221_v53  ;;  %v200_v53 = vsel %vm154_vm4, %v195_v36, %v199_v40  ;;  %v443_v36 = vshrl.u32 %v74_v1, 7  ;;  %v2614_v1 = vld [vmem:[%s3375_s0] sm:$0xff] }
  0xcd   :  { %2224 = vmatprep.subr.bf16.mxu0 %v2223_v54  ;;  %v157_v54 = vsel %vm154_vm4, %v155_v46, %v156_v43  ;;  %v222_v27 = vrot.slane %v200_v53, 1 }
  0xce   :  { %v2909_v37 = vsub.s32 1, %v443_v36 }
  0xcf   :  { %v223_v60 = vsel %vm205_vm3, %v221_v56, %v222_v27  ;;  %v235_v62 = vsel %vm205_vm3, %v222_v27, %v234_v61 }
  0xd0   :  { %2226 = vmatpush1.bf16.msra.mxu0 %v2225_v57  ;;  %v162_v57 = vsel %vm154_vm4, %v156_v43, %v161_v55  ;;  %v449_v39 = vrot.slane %v440_v22, %v2909_v37 }
  0xd1   :  { %2228 = vmatprep.subr.bf16.mxu0 %v2227_v58  ;;  %v218_v58 = vrot.slane %v193_v13, 1  ;;  %v2616_v13 = vld [vmem:[%s3375_s0 + $0x10] sm:$0xff] }
  0xd3   :  { %v220_v10 = vsel %vm205_vm3, %v218_v58, %v219_v59 }
  0xd4   :  { %2230 = vmatpush1.bf16.msra.mxu0 %v2229_v63  ;;  %v233_v63 = vsel %vm205_vm3, %v219_v59, %v232_v6  ;;  %v2617_v59 = vld [vmem:[%s3375_s0 + $0x18] sm:$0xff] }
  0xd5   :  { %2232 = vmatprep.subr.bf16.mxu0 %v2231_v0  ;;  %v934_v0 = vld [vmem:[#allocation6 + $0x188] sm:$0xff] }
  0xd6   :  { %v2299_v48 = vpack.c.bf16 %v936_v4, %v934_v0 }
  0xd8   :  { %2234 = vmatpush1.bf16.msra.mxu0 %v2233_v7  ;;  %v2301_v7 = vpack.c.bf16 %v935_v15, %v933_v5  ;;  %2300 = vmatprep.subr.bf16.mxu1 %v2299_v48  ;;  %v2618_v48 = vld [vmem:[%s3375_s0 + $0x20] sm:$0xff] }
  0xd9   :  { %2236 = vmatprep.subr.bf16.mxu0 %v2235_v8  ;;  %v938_v8 = vld [vmem:[#allocation6 + $0x1a8] sm:$0xff] }
  0xda   :  { %2302 = vmatpush1.bf16.msra.mxu1 %v2301_v7  ;;  %v2303_v11 = vpack.c.bf16 %v940_v9, %v938_v8  ;;  %v949_v8 = vld [vmem:[#allocation6 + $0x200] sm:$0xff]  ;;  %v951_v9 = vld [vmem:[#allocation6 + $0x210] sm:$0xff] }
  0xdc   :  { %2238 = vmatpush1.bf16.msra.mxu0 %v2237_v16  ;;  %v2305_v16 = vpack.c.bf16 %v939_v14, %v937_v12  ;;  %2304 = vmatprep.subr.bf16.mxu1 %v2303_v11  ;;  %v2619_v12 = vld [vmem:[%s3375_s0 + $0x28] sm:$0xff] }
  0xdd   :  { %2240 = vmatprep.subr.bf16.mxu0 %v2239_v20  ;;  %v942_v20 = vld [vmem:[#allocation6 + $0x1c8] sm:$0xff] }
  0xde   :  { %2306 = vmatpush1.bf16.msra.mxu1 %v2305_v16  ;;  %v2307_v17 = vpack.c.bf16 %v944_v44, %v942_v20  ;;  %v954_v20 = vld [vmem:[#allocation6 + $0x228] sm:$0xff]  ;;  %v956_v44 = vld [vmem:[#allocation6 + $0x238] sm:$0xff] }
  0xdf   :  { %v2319_v31 = vpack.c.bf16 %v956_v44, %v954_v20 }
  0xe0   :  { %2242 = vmatpush1.bf16.msra.mxu0 %v2241_v19  ;;  %v2309_v19 = vpack.c.bf16 %v943_v21, %v941_v18  ;;  %2308 = vmatprep.subr.bf16.mxu1 %v2307_v17 }
  0xe1   :  { %2244 = vmatprep.subr.bf16.mxu0 %v2243_v25  ;;  %v946_v25 = vld [vmem:[#allocation6 + $0x1e8] sm:$0xff] }
  0xe2   :  { %2310 = vmatpush1.bf16.msra.mxu1 %v2309_v19  ;;  %v2311_v29 = vpack.c.bf16 %v948_v26, %v946_v25  ;;  %v2317_v25 = vpack.c.bf16 %v951_v9, %v949_v8  ;;  %v2620_v26 = vld [vmem:[%s3375_s0 + $0x30] sm:$0xff] }
  0xe4   :  { %2246 = vmatpush1.bf16.msra.mxu0 %v2245_v34  ;;  %2312 = vmatprep.subr.bf16.mxu1 %v2311_v29  ;;  %v952_v34 = vld [vmem:[#allocation6 + $0x218] sm:$0xff] }
  0xe5   :  { %2248 = vmatprep.subr.bf16.mxu0 %v2247_v49  ;;  %v2315_v35 = vpack.c.bf16 %v952_v34, %v950_v33  ;;  %v2904_v49 = vsub.s32 0, %v443_v36  ;;  %v955_v33 = vld [vmem:[#allocation6 + $0x230] sm:$0xff]  ;;  %v2621_v34 = vld [vmem:[%s3375_s0 + $0x38] sm:$0xff] }
  0xe6   :  { %2314 = vmatpush1.bf16.msra.mxu1 %v2313_v32  ;;  %v953_v32 = vld [vmem:[#allocation6 + $0x220] sm:$0xff] }
  0xe7   :  { %2316 = vmatprep.subr.bf16.mxu1 %v2315_v35  ;;  %v445_v38 = vrot.slane %v440_v22, %v2904_v49  ;;  %v958_v22 = vld [vmem:[#allocation6 + $0x248] sm:$0xff] }
  0xe8   :  { %2250 = vmatpush1.bf16.msra.mxu0 %v2249_v45 }
  0xeb   :  { %695 = vmatmul.mubr.f32.vlgmr.msra.gmra.mrb[0].mxu0 %v157_v54 }
  0xec   :  { %700 = vmatprep.mubr.f32.mxu0 %v164_v47 }
  0xef   :  { %701 = vmatmul.mubr.f32.gmra.mrb[2].mxu0 %v162_v57 }
  0xf0   :  { %706 = vmatprep.mubr.f32.mxu0 %v223_v60 }
  0xf3   :  { %707 = vmatmul.mubr.f32.gmra.mrb[4].mxu0 %v220_v10 }
  0xf4   :  { %712 = vmatprep.mubr.f32.mxu0 %v235_v62 }
  0xf7   :  { %713 = vmatmul.mubr.f32.gmra.mrb[6].mxu0 %v233_v63 }
 0x1be   :  { %v696_v40 = vpop.f32.mrb[0].mxu0 }
 0x1bf   :  { %v2519_v41 = vadd.f32 %v696_v40, %v445_v38  ;;  %v698_v42 = vpop.f32.mrb[1].mxu0 }
 0x1c0   :  { %v2520_v43 = vadd.f32 %v698_v42, %v449_v39 }
 0x1c1   :  { %v719_v45 = vmax.f32 %v2519_v41, 0.0 }
 0x1c2   :  { %v720_v46 = vmax.f32 %v2520_v43, 0.0  ;;  %v702_v23 = vpop.f32.mrb[2].mxu0 }
 0x1c3   :  { %v2916_v24 = vadd.f32 %v2614_v1, %v719_v45  ;;  %v2521_v50 = vadd.f32 %v702_v23, %v445_v38  ;;  %v704_v3 = vpop.f32.mrb[3].mxu0  ;;  %v957_v23 = vld [vmem:[#allocation6 + $0x240] sm:$0xff] }
 0x1c4   :  { %v2921_v52 = vadd.f32 %v2615_v51, %v720_v46  ;;  %v2522_v53 = vadd.f32 %v704_v3, %v449_v39  ;;  %v2321_v46 = vpack.c.bf16 %v955_v33, %v953_v32  ;;  %v959_v3 = vld [vmem:[#allocation6 + $0x250] sm:$0xff]  ;;  %v962_v51 = vld [vmem:[#allocation6 + $0x268] sm:$0xff]  ;;  %v972_v33 = vld [vmem:[#allocation6 + $0x2b8] sm:$0xff] }
 0x1c5   :  { %v739_v54 = vrot.slane %v2916_v24, 7  ;;  %v721_v47 = vmax.f32 %v2521_v50, 0.0  ;;  %v970_v32 = vld [vmem:[#allocation6 + $0x2a8] sm:$0xff] }
 0x1c6   :  { %v740_v55 = vrot.slane %v2921_v52, 7  ;;  %v722_v56 = vmax.f32 %v2522_v53, 0.0  ;;  %v708_v27 = vpop.f32.mrb[4].mxu0  ;;  %v964_v53 = vld [vmem:[#allocation6 + $0x278] sm:$0xff] }
 0x1c7   :  { %751 = vst [vmem:[#allocation2] sm:$0xfe] %v739_v54  ;;  %v2928_v28 = vadd.f32 %v2616_v13, %v721_v47  ;;  %v2523_v57 = vadd.f32 %v708_v27, %v445_v38  ;;  %v710_v58 = vpop.f32.mrb[5].mxu0 }
 0x1c8   :  { %752 = vst [vmem:[#allocation2 + $0x8] sm:$0xfe] %v740_v55  ;;  %v2933_v60 = vadd.f32 %v2617_v59, %v722_v56  ;;  %v2524_v61 = vadd.f32 %v710_v58, %v449_v39  ;;  %v2325_v59 = vpack.c.bf16 %v959_v3, %v957_v23  ;;  %v978_v23 = vld [vmem:[#allocation6 + $0x2e8] sm:$0xff] }
 0x1c9   :  { %v741_v10 = vrot.slane %v2928_v28, 7  ;;  %v723_v6 = vmax.f32 %v2523_v57, 0.0 }
 0x1ca   :  { %v743_v62 = vrot.slane %v2933_v60, 7  ;;  %v724_v63 = vmax.f32 %v2524_v61, 0.0  ;;  %v714_v0 = vpop.f32.mrb[6].mxu0  ;;  %v2327_v61 = vpack.c.bf16 %v964_v53, %v962_v51  ;;  %v977_v53 = vld [vmem:[#allocation6 + $0x2e0] sm:$0xff] }
 0x1cb   :  { %v2938_v4 = vsel %vm98_vm2, %v739_v54, %v741_v10  ;;  %755 = vst [vmem:[#allocation2 + $0x20] sm:$0x1] %v741_v10  ;;  %v731_v5 = vadd.f32 %v2618_v48, %v723_v6  ;;  %v2525_v15 = vadd.f32 %v714_v0, %v445_v38  ;;  %v716_v7 = vpop.f32.mrb[7].mxu0  ;;  %v960_v38 = vld [vmem:[#allocation6 + $0x258] sm:$0xff] }
 0x1cc   :  { %v2944_v11 = vsel %vm98_vm2, %v740_v55, %v743_v62  ;;  %756 = vst [vmem:[#allocation2 + $0x28] sm:$0x1] %v743_v62  ;;  %v732_v14 = vadd.f32 %v2619_v12, %v724_v63  ;;  %v2526_v16 = vadd.f32 %v716_v7, %v449_v39  ;;  %v2323_v50 = vpack.c.bf16 %v960_v38, %v958_v22  ;;  %v961_v62 = vld [vmem:[#allocation6 + $0x260] sm:$0xff]  ;;  %v963_v63 = vld [vmem:[#allocation6 + $0x270] sm:$0xff]  ;;  %v966_v12 = vld [vmem:[#allocation6 + $0x288] sm:$0xff] }
 0x1cd   :  { %v761_v17 = vrot.slane %v731_v5, 6  ;;  %v725_v18 = vmax.f32 %v2525_v15, 0.0  ;;  %v817_v39 = vrot.slane %v731_v5, 7  ;;  %v2329_v44 = vpack.c.bf16 %v963_v63, %v961_v62  ;;  %v969_v38 = vld [vmem:[#allocation6 + $0x2a0] sm:$0xff]  ;;  %v987_v62 = vld [vmem:[#allocation6 + $0x330] sm:$0xff]  ;;  %v990_v63 = vld [vmem:[#allocation6 + $0x348] sm:$0xff] }
 0x1ce   :  { %v762_v21 = vrot.slane %v732_v14, 6  ;;  %v726_v19 = vmax.f32 %v2526_v16, 0.0  ;;  %v779_v36 = vld [vmem:[#allocation2] sm:$0xff]  ;;  %v818_v40 = vrot.slane %v732_v14, 7  ;;  %v968_v14 = vld [vmem:[#allocation6 + $0x298] sm:$0xff] }
 0x1cf   :  { %773 = vst [vmem:[#allocation2 + $0x20] sm:$0xfc] %v761_v17  ;;  %v733_v29 = vadd.f32 %v2620_v26, %v725_v18  ;;  %v780_v30 = vld [vmem:[#allocation2 + $0x8] sm:$0xff]  ;;  %v849_v57 = vrot.slane %v817_v39, 1 }
 0x1d0   :  { %774 = vst [vmem:[#allocation2 + $0x28] sm:$0xfc] %v762_v21  ;;  %v734_v35 = vadd.f32 %v2621_v34, %v726_v19  ;;  %1153 = vmatprep.mubr.f32.mxu1 %v780_v30  ;;  %v852_v27 = vrot.slane %v818_v40, 1  ;;  %v967_v26 = vld [vmem:[#allocation6 + $0x290] sm:$0xff] }
 0x1d1   :  { %v763_v41 = vrot.slane %v733_v29, 6  ;;  %v819_v42 = vrot.slane %v733_v29, 7  ;;  %1154 = vmatmul.mubr.f32.vlgmr.msra.gmra.mrb[0].mxu1 %v779_v36  ;;  %v2335_v36 = vpack.c.bf16 %v972_v33, %v970_v32  ;;  %v1002_v32 = vld [vmem:[#allocation6 + $0x3a8] sm:$0xff]  ;;  %v1004_v33 = vld [vmem:[#allocation6 + $0x3b8] sm:$0xff] }
 0x1d2   :  { %v765_v43 = vrot.slane %v734_v35, 6  ;;  %v821_v45 = vrot.slane %v734_v35, 7  ;;  %2318 = vmatpush1.bf16.msra.mxu1 %v2317_v25  ;;  %1159 = vmatprep.mubr.f32.mxu1 %v2944_v11  ;;  %v965_v25 = vld [vmem:[#allocation6 + $0x280] sm:$0xff] }
 0x1d3   :  { %v2957_v1 = vsel %vm121_vm1, %v761_v17, %v763_v41  ;;  %777 = vst [vmem:[#allocation2 + $0x40] sm:$0x3] %v763_v41  ;;  %2320 = vmatprep.subr.bf16.mxu1 %v2319_v31  ;;  %v820_v54 = vsel %vm98_vm2, %v817_v39, %v819_v42  ;;  %v865_v47 = vrot.slane %v819_v42, 1  ;;  %v2333_v34 = vpack.c.bf16 %v967_v26, %v965_v25  ;;  %v971_v39 = vld [vmem:[#allocation6 + $0x2b0] sm:$0xff]  ;;  %v976_v41 = vld [vmem:[#allocation6 + $0x2d8] sm:$0xff] }
 0x1d4   :  { %v2961_v55 = vsel %vm121_vm1, %v762_v21, %v765_v43  ;;  %778 = vst [vmem:[#allocation2 + $0x48] sm:$0x3] %v765_v43  ;;  %v822_v56 = vsel %vm98_vm2, %v818_v40, %v821_v45  ;;  %v850_v58 = vrot.slane %v820_v54, 1  ;;  %v867_v6 = vrot.slane %v821_v45, 1  ;;  %v974_v40 = vld [vmem:[#allocation6 + $0x2c8] sm:$0xff]  ;;  %v973_v45 = vld [vmem:[#allocation6 + $0x2c0] sm:$0xff] }
 0x1d5   :  { %1160 = vmatmul.mubr.f32.gmra.mrb[2].mxu1 %v2938_v4  ;;  %v853_v13 = vrot.slane %v822_v56, 1  ;;  %v847_v9 = vrot.slane %v2961_v55, 1  ;;  %v844_v20 = vrot.slane %v2957_v1, 1  ;;  %v2331_v21 = vpack.c.bf16 %v968_v14, %v966_v12  ;;  %v979_v54 = vld [vmem:[#allocation6 + $0x2f0] sm:$0xff]  ;;  %v984_v56 = vld [vmem:[#allocation6 + $0x318] sm:$0xff]  ;;  %v994_v14 = vld [vmem:[#allocation6 + $0x368] sm:$0xff] }
 0x1d6   :  { %2322 = vmatpush1.bf16.msra.mxu1 %v2321_v46  ;;  %v807_v10 = vld [vmem:[#allocation2 + $0x20] sm:$0xfe]  ;;  %v2969_v15 = vsel %vm205_vm3, %v849_v57, %v850_v58  ;;  %v2972_v7 = vsel %vm205_vm3, %v850_v58, %v865_v47  ;;  %v2337_v42 = vpack.c.bf16 %v971_v39, %v969_v38  ;;  %v2339_v43 = vpack.c.bf16 %v976_v41, %v974_v40  ;;  %v982_v47 = vld [vmem:[#allocation6 + $0x308] sm:$0xff]  ;;  %v1000_v25 = vld [vmem:[#allocation6 + $0x398] sm:$0xff] }
 0x1d7   :  { %2324 = vmatprep.subr.bf16.mxu1 %v2323_v50  ;;  %v808_v0 = vld [vmem:[#allocation2 + $0x28] sm:$0xfe]  ;;  %v843_v48 = vrot.slane %v807_v10, 1  ;;  %v2966_v5 = vsel %vm205_vm3, %v852_v27, %v853_v13  ;;  %v2976_v16 = vsel %vm205_vm3, %v853_v13, %v867_v6  ;;  %v975_v46 = vld [vmem:[#allocation6 + $0x2d0] sm:$0xff]  ;;  %v2345_v27 = vpack.c.bf16 %v979_v54, %v977_v53  ;;  %v981_v13 = vld [vmem:[#allocation6 + $0x300] sm:$0xff] }
 0x1d8   :  { %v846_v8 = vrot.slane %v808_v0, 1  ;;  %v980_v50 = vld [vmem:[#allocation6 + $0x2f8] sm:$0xff]  ;;  %v2341_v3 = vpack.c.bf16 %v975_v46, %v973_v45  ;;  %v983_v57 = vld [vmem:[#allocation6 + $0x310] sm:$0xff]  ;;  %v986_v58 = vld [vmem:[#allocation6 + $0x328] sm:$0xff] }
 0x1d9   :  { %v845_v19 = vsel %vm205_vm3, %v843_v48, %v844_v20  ;;  %v2343_v51 = vpack.c.bf16 %v980_v50, %v978_v23  ;;  %v985_v6 = vld [vmem:[#allocation6 + $0x320] sm:$0xff]  ;;  %v992_v0 = vld [vmem:[#allocation6 + $0x358] sm:$0xff]  ;;  %v991_v12 = vld [vmem:[#allocation6 + $0x350] sm:$0xff] }
 0x1da   :  { %2326 = vmatpush1.bf16.msra.mxu1 %v2325_v59  ;;  %v848_v17 = vsel %vm205_vm3, %v846_v8, %v847_v9  ;;  %v811_v18 = vld [vmem:[#allocation2 + $0x40] sm:$0x1]  ;;  %v988_v59 = vld [vmem:[#allocation6 + $0x338] sm:$0xff]  ;;  %v2353_v48 = vpack.c.bf16 %v987_v62, %v985_v6  ;;  %v2355_v8 = vpack.c.bf16 %v992_v0, %v990_v63 }
 0x1db   :  { %2328 = vmatprep.subr.bf16.mxu1 %v2327_v61  ;;  %1165 = vmatprep.mubr.f32.mxu1 %v848_v17  ;;  %v812_v29 = vld [vmem:[#allocation2 + $0x48] sm:$0x1]  ;;  %v861_v30 = vrot.slane %v811_v18, 1  ;;  %v2349_v61 = vpack.c.bf16 %v983_v57, %v981_v13  ;;  %v2351_v10 = vpack.c.bf16 %v988_v59, %v986_v58  ;;  %v993_v18 = vld [vmem:[#allocation6 + $0x360] sm:$0xff]  ;;  %v1006_v38 = vld [vmem:[#allocation6 + $0x3c8] sm:$0xff] }
 0x1dc   :  { %1166 = vmatmul.mubr.f32.gmra.mrb[4].mxu1 %v845_v19  ;;  %v863_v31 = vrot.slane %v812_v29, 1  ;;  %v998_v19 = vld [vmem:[#allocation6 + $0x388] sm:$0xff]  ;;  %v1008_v39 = vld [vmem:[#allocation6 + $0x3d8] sm:$0xff] }
 0x1dd   :  { %v862_v22 = vsel %vm205_vm3, %v844_v20, %v861_v30  ;;  %v996_v20 = vld [vmem:[#allocation6 + $0x378] sm:$0xff]  ;;  %v2363_v29 = vpack.c.bf16 %v1000_v25, %v998_v19  ;;  %v997_v30 = vld [vmem:[#allocation6 + $0x380] sm:$0xff]  ;;  %v2371_v41 = vpack.c.bf16 %v1008_v39, %v1006_v38  ;;  %v1010_v45 = vld [vmem:[#allocation6 + $0x3e8] sm:$0xff] }
 0x1de   :  { %2330 = vmatpush1.bf16.msra.mxu1 %v2329_v44  ;;  %v864_v35 = vsel %vm205_vm3, %v847_v9, %v863_v31  ;;  %v989_v9 = vld [vmem:[#allocation6 + $0x340] sm:$0xff]  ;;  %v2359_v17 = vpack.c.bf16 %v996_v20, %v994_v14  ;;  %v999_v31 = vld [vmem:[#allocation6 + $0x390] sm:$0xff]  ;;  %v1012_v46 = vld [vmem:[#allocation6 + $0x3f8] sm:$0xff] }
 0x1df   :  { %2332 = vmatprep.subr.bf16.mxu1 %v2331_v21  ;;  %1171 = vmatprep.mubr.f32.mxu1 %v864_v35  ;;  %v2357_v44 = vpack.c.bf16 %v991_v12, %v989_v9  ;;  %v995_v21 = vld [vmem:[#allocation6 + $0x370] sm:$0xff]  ;;  %v2367_v35 = vpack.c.bf16 %v1004_v33, %v1002_v32  ;;  %v2375_v50 = vpack.c.bf16 %v1012_v46, %v1010_v45  ;;  %v1014_v53 = vld [vmem:[#allocation6 + $0x408] sm:$0xff]  ;;  %v1016_v54 = vld [vmem:[#allocation6 + $0x418] sm:$0xff] }
 0x1e0   :  { %1172 = vmatmul.mubr.f32.gmra.mrb[6].mxu1 %v862_v22  ;;  %v2361_v26 = vpack.c.bf16 %v995_v21, %v993_v18  ;;  %v1003_v22 = vld [vmem:[#allocation6 + $0x3b0] sm:$0xff]  ;;  %v1018_v13 = vld [vmem:[#allocation6 + $0x428] sm:$0xff]  ;;  %v1020_v57 = vld [vmem:[#allocation6 + $0x438] sm:$0xff] }
 0x1e1   :  { %1242 = vmatprep.mubr.f32.mxu1 %v2921_v52  ;;  %v2347_v52 = vpack.c.bf16 %v984_v56, %v982_v47  ;;  %v2379_v56 = vpack.c.bf16 %v1016_v54, %v1014_v53  ;;  %v2383_v59 = vpack.c.bf16 %v1020_v57, %v1018_v13  ;;  %v1022_v6 = vld [vmem:[#allocation6 + $0x448] sm:$0xff]  ;;  %v1024_v62 = vld [vmem:[#allocation6 + $0x458] sm:$0xff]  ;;  %v1029_v25 = vld [vmem:[#allocation6 + $0x480] sm:$0xff] }
 0x1e2   :  { %2334 = vmatpush1.bf16.msra.mxu1 %v2333_v34  ;;  %v2365_v34 = vpack.c.bf16 %v999_v31, %v997_v30  ;;  %v2387_v0 = vpack.c.bf16 %v1024_v62, %v1022_v6  ;;  %v1026_v9 = vld [vmem:[#allocation6 + $0x468] sm:$0xff]  ;;  %v1028_v12 = vld [vmem:[#allocation6 + $0x478] sm:$0xff]  ;;  %v1033_v32 = vld [vmem:[#allocation6 + $0x4a0] sm:$0xff] }
 0x1e3   :  { %2336 = vmatprep.subr.bf16.mxu1 %v2335_v36  ;;  %v1001_v36 = vld [vmem:[#allocation6 + $0x3a0] sm:$0xff]  ;;  %v784_v20 = vld [vmem:[#allocation2 + $0x8] sm:$0xfc]  ;;  %v1035_v33 = vld [vmem:[#allocation6 + $0x4b0] sm:$0xff] }
 0x1e4   :  { %v2369_v40 = vpack.c.bf16 %v1003_v22, %v1001_v36  ;;  %v1032_v18 = vld [vmem:[#allocation6 + $0x498] sm:$0xff]  ;;  %v796_v21 = vrot.slane %v784_v20, 2  ;;  %v2401_v36 = vpack.c.bf16 %v1035_v33, %v1033_v32  ;;  %v1037_v38 = vld [vmem:[#allocation6 + $0x4c0] sm:$0xff]  ;;  %v1039_v39 = vld [vmem:[#allocation6 + $0x4d0] sm:$0xff] }
 0x1e5   :  { %v1036_v30 = vld [vmem:[#allocation6 + $0x4b8] sm:$0xff]  ;;  %v1043_v45 = vld [vmem:[#allocation6 + $0x4f0] sm:$0xff]  ;;  %v1046_v46 = vld [vmem:[#allocation6 + $0x508] sm:$0xff] }
 0x1e6   :  { %2338 = vmatpush1.bf16.msra.mxu1 %v2337_v42  ;;  %v1005_v42 = vld [vmem:[#allocation6 + $0x3c0] sm:$0xff]  ;;  %v1047_v53 = vld [vmem:[#allocation6 + $0x510] sm:$0xff]  ;;  %v1050_v54 = vld [vmem:[#allocation6 + $0x528] sm:$0xff] }
 0x1e7   :  { %2340 = vmatprep.subr.bf16.mxu1 %v2339_v43  ;;  %v1007_v43 = vld [vmem:[#allocation6 + $0x3d0] sm:$0xff]  ;;  %v1054_v57 = vld [vmem:[#allocation6 + $0x548] sm:$0xff]  ;;  %v1076_v33 = vld [vmem:[#allocation6 + $0x5f8] sm:$0xff] }
 0x1e8   :  { %v2373_v23 = vpack.c.bf16 %v1007_v43, %v1005_v42  ;;  %v1041_v43 = vld [vmem:[#allocation6 + $0x4e0] sm:$0xff]  ;;  %v1051_v13 = vld [vmem:[#allocation6 + $0x530] sm:$0xff]  ;;  %v1058_v62 = vld [vmem:[#allocation6 + $0x568] sm:$0xff] }
 0x1e9   :  { %v1055_v6 = vld [vmem:[#allocation6 + $0x550] sm:$0xff]  ;;  %v1074_v32 = vld [vmem:[#allocation6 + $0x5e8] sm:$0xff] }
 0x1ea   :  { %2342 = vmatpush1.bf16.msra.mxu1 %v2341_v3  ;;  %v1009_v3 = vld [vmem:[#allocation6 + $0x3e0] sm:$0xff] }
 0x1eb   :  { %2344 = vmatprep.subr.bf16.mxu1 %v2343_v51  ;;  %v1011_v51 = vld [vmem:[#allocation6 + $0x3f0] sm:$0xff] }
 0x1ec   :  { %v2377_v47 = vpack.c.bf16 %v1011_v51, %v1009_v3  ;;  %v1045_v51 = vld [vmem:[#allocation6 + $0x500] sm:$0xff] }
 0x1ee   :  { %2346 = vmatpush1.bf16.msra.mxu1 %v2345_v27  ;;  %v1013_v27 = vld [vmem:[#allocation6 + $0x400] sm:$0xff] }
 0x1ef   :  { %2348 = vmatprep.subr.bf16.mxu1 %v2347_v52  ;;  %v1015_v52 = vld [vmem:[#allocation6 + $0x410] sm:$0xff] }
 0x1f0   :  { %v2381_v58 = vpack.c.bf16 %v1015_v52, %v1013_v27  ;;  %v1049_v52 = vld [vmem:[#allocation6 + $0x520] sm:$0xff] }
 0x1f2   :  { %2350 = vmatpush1.bf16.msra.mxu1 %v2349_v61  ;;  %v1017_v61 = vld [vmem:[#allocation6 + $0x420] sm:$0xff] }
 0x1f3   :  { %2352 = vmatprep.subr.bf16.mxu1 %v2351_v10  ;;  %v1019_v10 = vld [vmem:[#allocation6 + $0x430] sm:$0xff] }
 0x1f4   :  { %v2385_v63 = vpack.c.bf16 %v1019_v10, %v1017_v61  ;;  %v1053_v10 = vld [vmem:[#allocation6 + $0x540] sm:$0xff] }
 0x1f6   :  { %2354 = vmatpush1.bf16.msra.mxu1 %v2353_v48  ;;  %v1021_v48 = vld [vmem:[#allocation6 + $0x440] sm:$0xff] }
 0x1f7   :  { %2356 = vmatprep.subr.bf16.mxu1 %v2355_v8  ;;  %v1023_v8 = vld [vmem:[#allocation6 + $0x450] sm:$0xff] }
 0x1f8   :  { %v2389_v14 = vpack.c.bf16 %v1023_v8, %v1021_v48  ;;  %v1057_v8 = vld [vmem:[#allocation6 + $0x560] sm:$0xff] }
 0x1fa   :  { %2358 = vmatpush1.bf16.msra.mxu1 %v2357_v44  ;;  %v2391_v44 = vpack.c.bf16 %v1028_v12, %v1026_v9  ;;  %v1059_v9 = vld [vmem:[#allocation6 + $0x570] sm:$0xff]  ;;  %v1062_v12 = vld [vmem:[#allocation6 + $0x588] sm:$0xff] }
 0x1fb   :  { %2360 = vmatprep.subr.bf16.mxu1 %v2359_v17  ;;  %v1027_v17 = vld [vmem:[#allocation6 + $0x470] sm:$0xff]  ;;  %v2425_v20 = vpack.c.bf16 %v1059_v9, %v1057_v8 }
 0x1fc   :  { %v1402_v8 = vld [vmem:[%s3380_s5 + $0x80] sm:$0xff]  ;;  %v1403_v9 = vld [vmem:[%s3380_s5 + $0x88] sm:$0xff] }
 0x1fe   :  { %2362 = vmatpush1.bf16.msra.mxu1 %v2361_v26  ;;  %v1031_v26 = vld [vmem:[#allocation6 + $0x490] sm:$0xff] }
 0x1ff   :  { %2364 = vmatprep.subr.bf16.mxu1 %v2363_v29  ;;  %v1034_v29 = vld [vmem:[#allocation6 + $0x4a8] sm:$0xff] }
 0x202   :  { %2366 = vmatpush1.bf16.msra.mxu1 %v2365_v34  ;;  %v1038_v34 = vld [vmem:[#allocation6 + $0x4c8] sm:$0xff] }
 0x203   :  { %2368 = vmatprep.subr.bf16.mxu1 %v2367_v35  ;;  %v1040_v35 = vld [vmem:[#allocation6 + $0x4d8] sm:$0xff] }
 0x204   :  { %v2403_v22 = vpack.c.bf16 %v1040_v35, %v1038_v34  ;;  %v2439_v35 = vpack.c.bf16 %v1076_v33, %v1074_v32  ;;  %v1392_v33 = vld [vmem:[%s3380_s5 + $0x30] sm:$0xff] }
 0x206   :  { %2370 = vmatpush1.bf16.msra.mxu1 %v2369_v40  ;;  %v1044_v40 = vld [vmem:[#allocation6 + $0x4f8] sm:$0xff] }
 0x207   :  { %2372 = vmatprep.subr.bf16.mxu1 %v2371_v41  ;;  %v2405_v41 = vpack.c.bf16 %v1039_v39, %v1037_v38  ;;  %v816_v38 = vld [vmem:[#allocation2 + $0x48] sm:$0x7]  ;;  %v783_v39 = vld [vmem:[#allocation2] sm:$0xfc] }
 0x20a   :  { %2374 = vmatpush1.bf16.msra.mxu1 %v2373_v23  ;;  %v1048_v23 = vld [vmem:[#allocation6 + $0x518] sm:$0xff] }
 0x20b   :  { %2376 = vmatprep.subr.bf16.mxu1 %v2375_v50  ;;  %v2409_v50 = vpack.c.bf16 %v1043_v45, %v1041_v43  ;;  %v2411_v3 = vpack.c.bf16 %v1048_v23, %v1046_v46  ;;  %v815_v43 = vld [vmem:[#allocation2 + $0x40] sm:$0x7]  ;;  %v833_v45 = vrot.slane %v2961_v55, 2  ;;  %v793_v46 = vrot.slane %v783_v39, 2 }
 0x20c   :  { %v1394_v39 = vld [vmem:[%s3380_s5 + $0x40] sm:$0xff] }
 0x20e   :  { %2378 = vmatpush1.bf16.msra.mxu1 %v2377_v47  ;;  %v1052_v47 = vld [vmem:[#allocation6 + $0x538] sm:$0xff] }
 0x20f   :  { %2380 = vmatprep.subr.bf16.mxu1 %v2379_v56  ;;  %v2413_v56 = vpack.c.bf16 %v1047_v53, %v1045_v51  ;;  %v2415_v27 = vpack.c.bf16 %v1052_v47, %v1050_v54  ;;  %v785_v51 = vld [vmem:[#allocation2 + $0x20] sm:$0x3]  ;;  %v835_v53 = vrot.slane %v815_v43, 2  ;;  %v794_v54 = vrot.slane %v2938_v4, 2 }
 0x211   :  { %1243 = vmatmul.mubr.f32.vlgmr.msra.gmra.mrb[0].mxu1 %v2916_v24  ;;  %v1025_v24 = vld [vmem:[#allocation6 + $0x460] sm:$0xff] }
 0x212   :  { %1248 = vmatprep.mubr.f32.mxu1 %v2933_v60  ;;  %2382 = vmatpush1.bf16.msra.mxu1 %v2381_v58  ;;  %v1030_v60 = vld [vmem:[#allocation6 + $0x488] sm:$0xff]  ;;  %v2393_v19 = vpack.c.bf16 %v1027_v17, %v1025_v24  ;;  %v1056_v58 = vld [vmem:[#allocation6 + $0x558] sm:$0xff]  ;;  %v1061_v24 = vld [vmem:[#allocation6 + $0x580] sm:$0xff] }
 0x213   :  { %2384 = vmatprep.subr.bf16.mxu1 %v2383_v59  ;;  %v2417_v59 = vpack.c.bf16 %v1051_v13, %v1049_v52  ;;  %v2419_v61 = vpack.c.bf16 %v1056_v58, %v1054_v57  ;;  %v1063_v17 = vld [vmem:[#allocation6 + $0x590] sm:$0xff]  ;;  %v795_v52 = vsel %vm154_vm4, %v793_v46, %v794_v54  ;;  %v799_v13 = vrot.slane %v785_v51, 2  ;;  %v1397_v46 = vld [vmem:[%s3380_s5 + $0x58] sm:$0xff] }
 0x215   :  { %1249 = vmatmul.mubr.f32.gmra.mrb[2].mxu1 %v2928_v28  ;;  %v797_v28 = vrot.slane %v2944_v11, 2 }
 0x216   :  { %1254 = vmatprep.mubr.f32.mxu1 %v2966_v5  ;;  %2386 = vmatpush1.bf16.msra.mxu1 %v2385_v63  ;;  %v2395_v5 = vpack.c.bf16 %v1032_v18, %v1030_v60  ;;  %v1060_v63 = vld [vmem:[#allocation6 + $0x578] sm:$0xff]  ;;  %v1066_v60 = vld [vmem:[#allocation6 + $0x5a8] sm:$0xff] }
 0x217   :  { %2388 = vmatprep.subr.bf16.mxu1 %v2387_v0  ;;  %v798_v31 = vsel %vm154_vm4, %v796_v21, %v797_v28  ;;  %v2421_v0 = vpack.c.bf16 %v1055_v6, %v1053_v10  ;;  %v2423_v48 = vpack.c.bf16 %v1060_v63, %v1058_v62  ;;  %v1068_v18 = vld [vmem:[#allocation6 + $0x5b8] sm:$0xff]  ;;  %v2429_v21 = vpack.c.bf16 %v1063_v17, %v1061_v24  ;;  %v1405_v17 = vld [vmem:[%s3380_s5 + $0x98] sm:$0xff] }
 0x218   :  { %v1404_v24 = vld [vmem:[%s3380_s5 + $0x90] sm:$0xff] }
 0x219   :  { %1255 = vmatmul.mubr.f32.gmra.mrb[4].mxu1 %v2969_v15  ;;  %v2397_v15 = vpack.c.bf16 %v1031_v26, %v1029_v25  ;;  %v1067_v25 = vld [vmem:[#allocation6 + $0x5b0] sm:$0xff]  ;;  %v1070_v26 = vld [vmem:[#allocation6 + $0x5c8] sm:$0xff] }
 0x21a   :  { %1260 = vmatprep.mubr.f32.mxu1 %v2976_v16  ;;  %2390 = vmatpush1.bf16.msra.mxu1 %v2389_v14  ;;  %v2399_v16 = vpack.c.bf16 %v1036_v30, %v1034_v29  ;;  %v1064_v14 = vld [vmem:[#allocation6 + $0x598] sm:$0xff] }
 0x21b   :  { %2392 = vmatprep.subr.bf16.mxu1 %v2391_v44  ;;  %v2427_v44 = vpack.c.bf16 %v1064_v14, %v1062_v12  ;;  %v1072_v29 = vld [vmem:[#allocation6 + $0x5d8] sm:$0xff]  ;;  %v2443_v12 = vpack.c.bf16 %v1403_v9, %v1402_v8  ;;  %v1386_v14 = vld [vmem:[%s3380_s5] sm:$0xff] }
 0x21d   :  { %1261 = vmatmul.mubr.f32.gmra.mrb[6].mxu1 %v2972_v7  ;;  %v1042_v7 = vld [vmem:[#allocation6 + $0x4e8] sm:$0xff]  ;;  %2444 = vmatprep.subr.bf16.mxu0 %v2443_v12 }
 0x21e   :  { %2394 = vmatpush1.bf16.msra.mxu1 %v2393_v19  ;;  %1331 = vmatprep.mubr.f32.mxu1 %v798_v31  ;;  %v2407_v42 = vpack.c.bf16 %v1044_v40, %v1042_v7  ;;  %v2431_v19 = vpack.c.bf16 %v1068_v18, %v1066_v60  ;;  %v2435_v31 = vpack.c.bf16 %v1072_v29, %v1070_v26  ;;  %v814_v7 = vld [vmem:[#allocation2 + $0x28] sm:$0xf8]  ;;  %v1388_v18 = vld [vmem:[%s3380_s5 + $0x10] sm:$0xff]  ;;  %v1390_v29 = vld [vmem:[%s3380_s5 + $0x20] sm:$0xff] }
 0x21f   :  { %2396 = vmatprep.subr.bf16.mxu1 %v2395_v5  ;;  %v1065_v5 = vld [vmem:[#allocation6 + $0x5a0] sm:$0xff]  ;;  %v832_v23 = vrot.slane %v814_v7, 2  ;;  %v2447_v60 = vpack.c.bf16 %v1405_v17, %v1404_v24  ;;  %v1395_v7 = vld [vmem:[%s3380_s5 + $0x48] sm:$0xff] }
 0x220   :  { %v2433_v30 = vpack.c.bf16 %v1067_v25, %v1065_v5  ;;  %v1406_v5 = vld [vmem:[%s3380_s5 + $0xa0] sm:$0xff]  ;;  %v1407_v25 = vld [vmem:[%s3380_s5 + $0xa8] sm:$0xff] }
 0x221   :  { %v834_v57 = vsel %vm154_vm4, %v832_v23, %v833_v45  ;;  %v2451_v26 = vpack.c.bf16 %v1407_v25, %v1406_v5 }
 0x222   :  { %2398 = vmatpush1.bf16.msra.mxu1 %v2397_v15  ;;  %v1069_v15 = vld [vmem:[#allocation6 + $0x5c0] sm:$0xff]  ;;  %v858_v4 = vrot.slane %v834_v57, 1 }
 0x223   :  { %2400 = vmatprep.subr.bf16.mxu1 %v2399_v16  ;;  %v1071_v16 = vld [vmem:[#allocation6 + $0x5d0] sm:$0xff]  ;;  %v1401_v57 = vld [vmem:[%s3380_s5 + $0x78] sm:$0xff] }
 0x224   :  { %v2437_v34 = vpack.c.bf16 %v1071_v16, %v1069_v15  ;;  %v1408_v15 = vld [vmem:[%s3380_s5 + $0xb0] sm:$0xff]  ;;  %v1409_v16 = vld [vmem:[%s3380_s5 + $0xb8] sm:$0xff] }
 0x225   :  { %v2455_v32 = vpack.c.bf16 %v1409_v16, %v1408_v15 }
 0x226   :  { %2402 = vmatpush1.bf16.msra.mxu1 %v2401_v36  ;;  %v1073_v36 = vld [vmem:[#allocation6 + $0x5e0] sm:$0xff] }
 0x227   :  { %2404 = vmatprep.subr.bf16.mxu1 %v2403_v22  ;;  %v1075_v22 = vld [vmem:[#allocation6 + $0x5f0] sm:$0xff] }
 0x228   :  { %v2441_v40 = vpack.c.bf16 %v1075_v22, %v1073_v36  ;;  %v1410_v36 = vld [vmem:[%s3380_s5 + $0xc0] sm:$0xff]  ;;  %v1411_v22 = vld [vmem:[%s3380_s5 + $0xc8] sm:$0xff] }
 0x22a   :  { %2406 = vmatpush1.bf16.msra.mxu1 %v2405_v41  ;;  %v786_v41 = vld [vmem:[#allocation2 + $0x28] sm:$0x3] }
 0x22b   :  { %2408 = vmatprep.subr.bf16.mxu1 %v2407_v42  ;;  %v837_v42 = vrot.slane %v816_v38, 2  ;;  %v2459_v38 = vpack.c.bf16 %v1411_v22, %v1410_v36 }
 0x22d   :  { %v838_v47 = vsel %vm154_vm4, %v833_v45, %v837_v42  ;;  %v871_v62 = vrot.slane %v837_v42, 1  ;;  %v1413_v42 = vld [vmem:[%s3380_s5 + $0xd8] sm:$0xff]  ;;  %v1396_v45 = vld [vmem:[%s3380_s5 + $0x50] sm:$0xff] }
 0x22e   :  { %2410 = vmatpush1.bf16.msra.mxu1 %v2409_v50  ;;  %v813_v50 = vld [vmem:[#allocation2 + $0x20] sm:$0xf8]  ;;  %v859_v58 = vrot.slane %v838_v47, 1  ;;  %v2465_v23 = vpack.c.bf16 %v1397_v46, %v1396_v45 }
 0x22f   :  { %2412 = vmatprep.subr.bf16.mxu1 %v2411_v3  ;;  %v801_v3 = vrot.slane %v786_v41, 2  ;;  %v1412_v41 = vld [vmem:[%s3380_s5 + $0xd0] sm:$0xff] }
 0x230   :  { %v860_v6 = vsel %vm205_vm3, %v858_v4, %v859_v58  ;;  %v2463_v43 = vpack.c.bf16 %v1413_v42, %v1412_v41 }
 0x231   :  { %v802_v55 = vsel %vm154_vm4, %v797_v28, %v801_v3  ;;  %v872_v28 = vsel %vm205_vm3, %v859_v58, %v871_v62  ;;  %v1415_v3 = vld [vmem:[%s3380_s5 + $0xe8] sm:$0xff]  ;;  %v1077_v58 = vld [vmem:[%s3379_s4] sm:$0x3] }
 0x232   :  { %2414 = vmatpush1.bf16.msra.mxu1 %v2413_v56  ;;  %v830_v56 = vrot.slane %v2957_v1, 2  ;;  %v800_v1 = vsel %vm154_vm4, %v794_v54, %v799_v13  ;;  %v1399_v54 = vld [vmem:[%s3380_s5 + $0x68] sm:$0xff]  ;;  %v1400_v13 = vld [vmem:[%s3380_s5 + $0x70] sm:$0xff]  ;;  %v1082_v4 = vrot.slane %v1077_v58, %v2904_v49 }
 0x233   :  { %2416 = vmatprep.subr.bf16.mxu1 %v2415_v27  ;;  %v829_v27 = vrot.slane %v813_v50, 2  ;;  %v1414_v50 = vld [vmem:[%s3380_s5 + $0xe0] sm:$0xff] }
 0x234   :  { %v2467_v51 = vpack.c.bf16 %v1415_v3, %v1414_v50  ;;  %v1960_v50 = vld.sshfl [vmem:[%s3382_s7] sm:$0x33 pattern:$0x76325410] }
 0x235   :  { %v1517_v3 = vcombine.high %v1960_v50, %v1960_v50 }
 0x236   :  { %2418 = vmatpush1.bf16.msra.mxu1 %v2417_v59  ;;  %v836_v59 = vsel %vm154_vm4, %v830_v56, %v835_v53 }
 0x237   :  { %2420 = vmatprep.subr.bf16.mxu1 %v2419_v61  ;;  %v831_v61 = vsel %vm154_vm4, %v829_v27, %v830_v56  ;;  %v856_v10 = vrot.slane %v836_v59, 1  ;;  %v1416_v56 = vld [vmem:[%s3380_s5 + $0xf0] sm:$0xff]  ;;  %v1417_v27 = vld [vmem:[%s3380_s5 + $0xf8] sm:$0xff] }
 0x238   :  { %v855_v63 = vrot.slane %v831_v61, 1 }
 0x23a   :  { %2422 = vmatpush1.bf16.msra.mxu1 %v2421_v0  ;;  %v857_v11 = vsel %vm205_vm3, %v855_v63, %v856_v10  ;;  %v869_v0 = vrot.slane %v835_v53, 1  ;;  %v1398_v53 = vld [vmem:[%s3380_s5 + $0x60] sm:$0xff] }
 0x23b   :  { %2424 = vmatprep.subr.bf16.mxu1 %v2423_v48  ;;  %v2469_v47 = vpack.c.bf16 %v1399_v54, %v1398_v53  ;;  %v1959_v53 = vld [vmem:[%s3381_s6] ss:$0 sm:$0xff] }
 0x23c   :  { %v870_v48 = vsel %vm205_vm3, %v856_v10, %v869_v0 }
 0x23e   :  { %2426 = vmatpush1.bf16.msra.mxu1 %v2425_v20  ;;  %v1387_v20 = vld [vmem:[%s3380_s5 + $0x8] sm:$0xff] }
 0x23f   :  { %2428 = vmatprep.subr.bf16.mxu1 %v2427_v44  ;;  %v2445_v44 = vpack.c.bf16 %v1387_v20, %v1386_v14 }
 0x241   :  { %2446 = vmatpush3.bf16.msra.mxu0 %v2445_v44 }
 0x242   :  { %2430 = vmatpush1.bf16.msra.mxu1 %v2429_v21  ;;  %v1389_v21 = vld [vmem:[%s3380_s5 + $0x18] sm:$0xff]  ;;  %2448 = vmatprep.subr.bf16.mxu0 %v2447_v60 }
 0x243   :  { %2432 = vmatprep.subr.bf16.mxu1 %v2431_v19  ;;  %v2449_v19 = vpack.c.bf16 %v1389_v21, %v1388_v18 }
 0x245   :  { %2450 = vmatpush3.bf16.msra.mxu0 %v2449_v19 }
 0x246   :  { %2434 = vmatpush1.bf16.msra.mxu1 %v2433_v30  ;;  %v1391_v30 = vld [vmem:[%s3380_s5 + $0x28] sm:$0xff]  ;;  %2452 = vmatprep.subr.bf16.mxu0 %v2451_v26 }
 0x247   :  { %2436 = vmatprep.subr.bf16.mxu1 %v2435_v31  ;;  %v2453_v31 = vpack.c.bf16 %v1391_v30, %v1390_v29 }
 0x249   :  { %2454 = vmatpush3.bf16.msra.mxu0 %v2453_v31 }
 0x24a   :  { %2438 = vmatpush1.bf16.msra.mxu1 %v2437_v34  ;;  %v1393_v34 = vld [vmem:[%s3380_s5 + $0x38] sm:$0xff]  ;;  %2456 = vmatprep.subr.bf16.mxu0 %v2455_v32 }
 0x24b   :  { %2440 = vmatprep.subr.bf16.mxu1 %v2439_v35  ;;  %v2457_v35 = vpack.c.bf16 %v1393_v34, %v1392_v33 }
 0x24d   :  { %2458 = vmatpush3.bf16.msra.mxu0 %v2457_v35 }
 0x24e   :  { %2442 = vmatpush1.bf16.msra.mxu1 %v2441_v40  ;;  %v2461_v40 = vpack.c.bf16 %v1395_v7, %v1394_v39  ;;  %2460 = vmatprep.subr.bf16.mxu0 %v2459_v38 }
 0x251   :  { %1332 = vmatmul.mubr.f32.vlgmr.msra.gmra.mrb[0].mxu1 %v795_v52  ;;  %2462 = vmatpush3.bf16.msra.mxu0 %v2461_v40  ;;  %v2471_v52 = vpack.c.bf16 %v1417_v27, %v1416_v56 }
 0x252   :  { %1337 = vmatprep.mubr.f32.mxu1 %v802_v55  ;;  %2464 = vmatprep.subr.bf16.mxu0 %v2463_v43  ;;  %v2473_v55 = vpack.c.bf16 %v1401_v57, %v1400_v13  ;;  %v1650_v13 = vld [vmem:[%s3384_s9 + $0x88] sm:$0xff] }
 0x255   :  { %1338 = vmatmul.mubr.f32.gmra.mrb[2].mxu1 %v800_v1  ;;  %2466 = vmatpush3.bf16.msra.mxu0 %v2465_v23  ;;  %v1086_v1 = vrot.slane %v1077_v58, %v2909_v37  ;;  %v1634_v58 = vld [vmem:[%s3384_s9 + $0x8] sm:$0xff] }
 0x256   :  { %1343 = vmatprep.mubr.f32.mxu1 %v860_v6  ;;  %2468 = vmatprep.subr.bf16.mxu0 %v2467_v51 }
 0x259   :  { %1344 = vmatmul.mubr.f32.gmra.mrb[4].mxu1 %v857_v11  ;;  %2470 = vmatpush3.bf16.msra.mxu0 %v2469_v47 }
 0x25a   :  { %1349 = vmatprep.mubr.f32.mxu1 %v872_v28  ;;  %2472 = vmatprep.subr.bf16.mxu0 %v2471_v52  ;;  %v1649_v52 = vld [vmem:[%s3384_s9 + $0x80] sm:$0xff] }
 0x25b   :  { %v2475_v57 = vpack.c.bf16 %v1650_v13, %v1649_v52 }
 0x25d   :  { %1350 = vmatmul.mubr.f32.gmra.mrb[6].mxu1 %v870_v48  ;;  %2474 = vmatpush3.bf16.msra.mxu0 %v2473_v55  ;;  %v1633_v55 = vld [vmem:[%s3384_s9] sm:$0xff] }
 0x25e   :  { %1961 = vmatprep.subr.msk.mxu0 %vm121_vm1, %v1517_v3  ;;  %2476 = vmatprep.subr.bf16.mxu1 %v2475_v57  ;;  %v1648_v3 = vld [vmem:[%s3384_s9 + $0x78] sm:$0xff] }
 0x324   :  { %v1333_v59 = vpop.f32.mrb[0].mxu1 }
 0x325   :  { %v1335_v61 = vpop.f32.mrb[1].mxu1  ;;  %v3112_v6 = vadd.f32 %v1333_v59, %v1082_v4  ;;  %v2477_v59 = vpack.c.bf16 %v1634_v58, %v1633_v55 }
 0x326   :  { %v3116_v11 = vadd.f32 %v1335_v61, %v1086_v1  ;;  %v1652_v61 = vld [vmem:[%s3384_s9 + $0x98] sm:$0xff] }
 0x327   :  { %2478 = vmatpush3.bf16.msra.mxu1 %v2477_v59 }
 0x328   :  { %v1339_v10 = vpop.f32.mrb[2].mxu1 }
 0x329   :  { %v3114_v62 = vadd.f32 %v1339_v10, %v1082_v4  ;;  %v1341_v63 = vpop.f32.mrb[3].mxu1  ;;  %v1635_v10 = vld [vmem:[%s3384_s9 + $0x10] sm:$0xff] }
 0x32a   :  { %v3118_v0 = vadd.f32 %v1341_v63, %v1086_v1  ;;  %v1636_v63 = vld [vmem:[%s3384_s9 + $0x18] sm:$0xff] }
 0x32b   :  { %v1356_v28 = vadd.f32 %v3114_v62, %v3112_v6 }
 0x32c   :  { %v1363_v48 = vadd.f32 %v3118_v0, %v3116_v11  ;;  %v1345_v8 = vpop.f32.mrb[4].mxu1 }
 0x32d   :  { %v1357_v9 = vrot.slane %v1356_v28, 4  ;;  %v1347_v12 = vpop.f32.mrb[5].mxu1  ;;  %v3124_v17 = vadd.f32 %v1345_v8, %v1082_v4  ;;  %v1654_v8 = vld [vmem:[%s3384_s9 + $0xa8] sm:$0xff] }
 0x32e   :  { %v1364_v14 = vrot.slane %v1363_v48, 4  ;;  %v3128_v21 = vadd.f32 %v1347_v12, %v1086_v1  ;;  %v1637_v12 = vld [vmem:[%s3384_s9 + $0x20] sm:$0xff] }
 0x32f   :  { %v1358_v24 = vadd.f32 %v1357_v9, %v1356_v28  ;;  %v2481_v28 = vpack.c.bf16 %v1636_v63, %v1635_v10 }
 0x330   :  { %v1365_v20 = vadd.f32 %v1364_v14, %v1363_v48  ;;  %v1351_v44 = vpop.f32.mrb[6].mxu1  ;;  %v1653_v48 = vld [vmem:[%s3384_s9 + $0xa0] sm:$0xff]  ;;  %v1638_v14 = vld [vmem:[%s3384_s9 + $0x28] sm:$0xff] }
 0x331   :  { %v3126_v60 = vadd.f32 %v1351_v44, %v1082_v4  ;;  %v1353_v18 = vpop.f32.mrb[7].mxu1  ;;  %v1359_v29 = vrot.slane %v1358_v24, 2  ;;  %v1651_v4 = vld [vmem:[%s3384_s9 + $0x90] sm:$0xff]  ;;  %v2483_v9 = vpack.c.bf16 %v1654_v8, %v1653_v48 }
 0x332   :  { %v3130_v19 = vadd.f32 %v1353_v18, %v1086_v1  ;;  %v1366_v25 = vrot.slane %v1365_v20, 2  ;;  %v2479_v1 = vpack.c.bf16 %v1652_v61, %v1651_v4  ;;  %v1655_v44 = vld [vmem:[%s3384_s9 + $0xb0] sm:$0xff] }
 0x333   :  { %v1370_v5 = vadd.f32 %v3126_v60, %v3124_v17  ;;  %v1360_v33 = vadd.f32 %v1359_v29, %v1358_v24  ;;  %v1656_v24 = vld [vmem:[%s3384_s9 + $0xb8] sm:$0xff]  ;;  %v1657_v29 = vld [vmem:[%s3384_s9 + $0xc0] sm:$0xff] }
 0x334   :  { %v1377_v26 = vadd.f32 %v3130_v19, %v3128_v21  ;;  %v1367_v16 = vadd.f32 %v1366_v25, %v1365_v20  ;;  %2480 = vmatprep.subr.bf16.mxu1 %v2479_v1  ;;  %v2485_v20 = vpack.c.bf16 %v1638_v14, %v1637_v12  ;;  %v2487_v18 = vpack.c.bf16 %v1656_v24, %v1655_v44  ;;  %v1640_v25 = vld [vmem:[%s3384_s9 + $0x38] sm:$0xff]  ;;  %v1766_v44 = vld [vmem:[%s3386_s11 + $0x28] sm:$0xff] }
 0x335   :  { %v1371_v30 = vrot.slane %v1370_v5, 4  ;;  %v1361_v39 = vrot.slane %v1360_v33, 1  ;;  %2482 = vmatpush3.bf16.msra.mxu1 %v2481_v28  ;;  %v1768_v24 = vld [vmem:[%s3386_s11 + $0x38] sm:$0xff] }
 0x336   :  { %v1378_v31 = vrot.slane %v1377_v26, 4  ;;  %v1368_v38 = vrot.slane %v1367_v16, 1  ;;  %2484 = vmatprep.subr.bf16.mxu1 %v2483_v9 }
 0x337   :  { %v1372_v15 = vadd.f32 %v1371_v30, %v1370_v5  ;;  %v1362_v45 = vadd.f32 %v1361_v39, %v1360_v33  ;;  %v1639_v5 = vld [vmem:[%s3384_s9 + $0x30] sm:$0xff]  ;;  %v1658_v30 = vld [vmem:[%s3384_s9 + $0xc8] sm:$0xff] }
 0x338   :  { %v1379_v32 = vadd.f32 %v1378_v31, %v1377_v26  ;;  %v1369_v42 = vadd.f32 %v1368_v38, %v1367_v16  ;;  %v2489_v26 = vpack.c.bf16 %v1640_v25, %v1639_v5  ;;  %v2491_v31 = vpack.c.bf16 %v1658_v30, %v1657_v29  ;;  %v1642_v16 = vld [vmem:[%s3384_s9 + $0x48] sm:$0xff]  ;;  %v1659_v33 = vld [vmem:[%s3384_s9 + $0xd0] sm:$0xff]  ;;  %v1661_v38 = vld [vmem:[%s3384_s9 + $0xe0] sm:$0xff] }
 0x339   :  { %v1373_v34 = vrot.slane %v1372_v15, 2  ;;  %2486 = vmatpush3.bf16.msra.mxu1 %v2485_v20  ;;  %v1662_v39 = vld [vmem:[%s3384_s9 + $0xe8] sm:$0xff]  ;;  %v1765_v5 = vld [vmem:[%s3386_s11 + $0x20] sm:$0xff]  ;;  %v1767_v25 = vld [vmem:[%s3386_s11 + $0x30] sm:$0xff]  ;;  %v2683_v30 = vmov 0  }
 0x33a   :  { %v1380_v35 = vrot.slane %v1379_v32, 2  ;;  %2488 = vmatprep.subr.bf16.mxu1 %v2487_v18  ;;  %v2511_v18 = vpack.c.bf16 %v1768_v24, %v1766_v44  ;;  %v1967_v29 = vld [vmem:[#allocation3] ss:$0 sm:$0xff]  ;;  %2573 = vset.pattern.permute.xlu0 %v2683_v30 }
 0x33b   :  { %v1374_v36 = vadd.f32 %v1373_v34, %v1372_v15  ;;  %v1641_v15 = vld [vmem:[%s3384_s9 + $0x40] sm:$0xff]  ;;  %v1660_v34 = vld [vmem:[%s3384_s9 + $0xd8] sm:$0xff]  ;;  %1776 = vperm.xlu0 %2573, %v1967_v29  }
 0x33c   :  { %v1381_v22 = vadd.f32 %v1380_v35, %v1379_v32  ;;  %v2493_v32 = vpack.c.bf16 %v1642_v16, %v1641_v15  ;;  %v1643_v35 = vld [vmem:[%s3384_s9 + $0x50] sm:$0xff]  ;;  %v1966_v15 = vld [vmem:[%s3385_s10] ss:$0 sm:$0xff] }
 0x33d   :  { %v1375_v7 = vrot.slane %v1374_v36, 1  ;;  %2490 = vmatpush3.bf16.msra.mxu1 %v2489_v26  ;;  %v2513_v26 = vpack.c.bf16 %v1767_v25, %v1765_v5 }
 0x33e   :  { %v1382_v40 = vrot.slane %v1381_v22, 1  ;;  %2492 = vmatprep.subr.bf16.mxu1 %v2491_v31 }
 0x33f   :  { %v1376_v41 = vadd.f32 %v1375_v7, %v1374_v36  ;;  %v2495_v36 = vpack.c.bf16 %v1660_v34, %v1659_v33 }
 0x340   :  { %v1383_v43 = vadd.f32 %v1382_v40, %v1381_v22  ;;  %v1644_v22 = vld [vmem:[%s3384_s9 + $0x58] sm:$0xff]  ;;  %v2499_v40 = vpack.c.bf16 %v1662_v39, %v1661_v38 }
 0x341   :  { %v1384_v23 = vsel %vm98_vm2, %v1362_v45, %v1376_v41  ;;  %2494 = vmatpush3.bf16.msra.mxu1 %v2493_v32  ;;  %v2497_v7 = vpack.c.bf16 %v1644_v22, %v1643_v35  ;;  %v1645_v41 = vld [vmem:[%s3384_s9 + $0x60] sm:$0xff]  ;;  %v1664_v45 = vld [vmem:[%s3384_s9 + $0xf8] sm:$0xff] }
 0x342   :  { %v1385_v46 = vsel %vm98_vm2, %v1369_v42, %v1383_v43  ;;  %2496 = vmatprep.subr.bf16.mxu1 %v2495_v36  ;;  %v1646_v42 = vld [vmem:[%s3384_s9 + $0x68] sm:$0xff]  ;;  %v1663_v43 = vld [vmem:[%s3384_s9 + $0xf0] sm:$0xff] }
 0x343   :  { %1489 = vmatprep.mubr.f32.mxu0 %v1385_v46  ;;  %v2501_v46 = vpack.c.bf16 %v1646_v42, %v1645_v41 }
 0x344   :  { %1490 = vmatmul.mubr.f32.vlgmr.msra.gmra.mrb[8].mxu0 %v1384_v23  ;;  %v2503_v23 = vpack.c.bf16 %v1664_v45, %v1663_v43 }
 0x345   :  { %1590 = vmatprep.mubr.f32.mxu0 %v2682_v2  ;;  %1962 = vmatpush1.msk.msra.mxu0 %vm121_vm1, %v1960_v50  ;;  %v1647_v50 = vld [vmem:[%s3384_s9 + $0x70] sm:$0xff] }
 0x346   :  { %2498 = vmatpush3.bf16.msra.mxu1 %v2497_v7 }
 0x347   :  { %2500 = vmatprep.subr.bf16.mxu1 %v2499_v40 }
 0x34a   :  { %2502 = vmatpush3.bf16.msra.mxu1 %v2501_v46 }
 0x34b   :  { %2504 = vmatprep.subr.bf16.mxu1 %v2503_v23 }
 0x417   :  { %v2012_v51 = vpop.f32.mrb[8].mxu0 }
 0x418   :  { %v2013_v54 = vpop.f32.mrb[9].mxu0 }
 0x419   :  { %v2014_v47 = vadd.f32 %v2013_v54, %v2012_v51  ;;  %v2505_v51 = vpack.c.bf16 %v1648_v3, %v1647_v50 }
 0x41b   :  { %v1492_v56 = vadd.f32 %v2014_v47, %v1959_v53  ;;  %2506 = vmatpush3.bf16.msra.mxu1 %v2505_v51  ;;  %v1497_v53 = vld [vmem:[%s3383_s8] sm:$0x3]  ;;  %v1777_v51 = vpop.permute.xlu0 %1776 }
 0x41c   :  { %v1502_v54 = vrot.slane %v1497_v53, %v2904_v49  ;;  %v1506_v47 = vrot.slane %v1497_v53, %v2909_v37 }
 0x41d   :  { %v1495_v27 = vmax.f32 %v1492_v56, 0.0 }
 0x41f   :  { %1963 = vmatmul.mubr.msk.f32.vlgmr.msra.gmra.mrb[10].mxu0 %vm1518_vm5, %v1495_v27 }
 0x420   :  { %1856 = vmatprep.mubr.f32.mxu0 %v2682_v2 }
 0x4f2   :  { %v1592_v56 = vpop.f32.mrb[10].mxu0 }
 0x4f3   :  { %v1593_v27 = vadd.f32 %v1592_v56, %v1502_v54  ;;  %v1594_v52 = vpop.f32.mrb[11].mxu0 }
 0x4f4   :  { %v1595_v13 = vadd.f32 %v1594_v52, %v1506_v47 }
 0x4f5   :  { %v1964_v57 = vmul.f32 -1.442695, %v1593_v27 }
 0x4f6   :  { %v1965_v55 = vmul.f32 -1.442695, %v1595_v13 }
 0x4f7   :  { %2574 = vpow2.f32 %v1964_v57 }
 0x4f8   :  { %2576 = vpow2.f32 %v1965_v55 }
 0x501   :  { %v2575_v58 = vpop.eup %2574 }
 0x502   :  { %v2577_v59 = vpop.eup %2576  ;;  %v1603_v4 = vadd.f32 1.0, %v2575_v58 }
 0x503   :  { %v1604_v61 = vadd.f32 1.0, %v2577_v59 }
 0x504   :  { %2578 = vrcp.f32 %v1603_v4 }
 0x505   :  { %2580 = vrcp.f32 %v1604_v61 }
 0x50e   :  { %v2579_v1 = vpop.eup %2578 }
 0x50f   :  { %v2581_v10 = vpop.eup %2580  ;;  %v1612_v63 = vrot.slane %v2579_v1, %v2904_v49 }
 0x510   :  { %v1616_v28 = vrot.slane %v2581_v10, %v2904_v49  ;;  %v1628_v12 = vrot.slane %v2581_v10, %v2909_v37  ;;  %v1624_v49 = vrot.slane %v2579_v1, %v2909_v37  ;;  %v1762_v37 = vld [vmem:[%s3386_s11 + $0x8] sm:$0xff] }
 0x511   :  { %v3255_v8 = vmul.f32 %v3112_v6, %v1612_v63  ;;  %v3265_v14 = vmul.f32 %v3114_v62, %v1612_v63 }
 0x512   :  { %v3252_v48 = vmul.f32 %v3116_v11, %v1616_v28  ;;  %v3259_v9 = vmul.f32 %v3118_v0, %v1616_v28  ;;  %v3269_v11 = vmul.f32 %v3128_v21, %v1628_v12  ;;  %v3274_v6 = vmul.f32 %v3124_v17, %v1624_v49  ;;  %v1764_v17 = vld [vmem:[%s3386_s11 + $0x18] sm:$0xff] }
 0x513   :  { %v3277_v0 = vmul.f32 %v3130_v19, %v1628_v12  ;;  %v3282_v62 = vmul.f32 %v3126_v60, %v1624_v49  ;;  %v2507_v21 = vpack.c.bf16 %v1764_v17, %v1762_v37  ;;  %v1761_v19 = vld [vmem:[%s3386_s11] sm:$0xff]  ;;  %v1763_v60 = vld [vmem:[%s3386_s11 + $0x10] sm:$0xff] }
 0x514   :  { %1736 = vmatprep.mubr.f32.mxu1 %v3252_v48  ;;  %v2509_v20 = vpack.c.bf16 %v1763_v60, %v1761_v19 }
 0x515   :  { %1737 = vmatmul.mubr.f32.vlgmr.msra.gmra.mrb[8].mxu1 %v3255_v8  ;;  %2508 = vmatprep.subr.bf16.mxu0 %v2507_v21 }
 0x516   :  { %1741 = vmatprep.mubr.f32.mxu1 %v3259_v9  ;;  %2515 = vmatprep.subr.bf16.mxu1 %v2507_v21 }
 0x517   :  { %2510 = vmatpush1.bf16.msra.mxu0 %v2509_v20  ;;  %2517 = vmatpush1.bf16.msra.mxu1 %v2509_v20 }
 0x518   :  { %2512 = vmatprep.subr.bf16.mxu0 %v2511_v18  ;;  %2516 = vmatprep.subr.bf16.mxu1 %v2511_v18 }
 0x519   :  { %1742 = vmatmul.mubr.f32.gmra.mrb[10].mxu1 %v3265_v14 }
 0x51a   :  { %1746 = vmatprep.mubr.f32.mxu1 %v3269_v11 }
 0x51b   :  { %2514 = vmatpush1.bf16.msra.mxu0 %v2513_v26  ;;  %2518 = vmatpush1.bf16.msra.mxu1 %v2513_v26 }
 0x51d   :  { %1747 = vmatmul.mubr.f32.gmra.mrb[12].mxu1 %v3274_v6 }
 0x51e   :  { %1751 = vmatprep.mubr.f32.mxu1 %v3277_v0 }
 0x521   :  { %1752 = vmatmul.mubr.f32.gmra.mrb[14].mxu1 %v3282_v62 }
 0x522   :  { %1874 = vmatprep.mubr.f32.mxu1 %v2682_v2 }
 0x5e8   :  { %v2047_v31 = vpop.f32.mrb[8].mxu1 }
 0x5e9   :  { %v2048_v16 = vpop.f32.mrb[9].mxu1 }
 0x5ea   :  { %v2049_v32 = vadd.f32 %v2048_v16, %v2047_v31 }
 0x5ec   :  { %v1739_v33 = vadd.f32 %v2049_v32, %v1966_v15  ;;  %v2050_v34 = vpop.f32.mrb[10].mxu1 }
 0x5ed   :  { %v2051_v35 = vpop.f32.mrb[11].mxu1 }
 0x5ee   :  { %v1757_v36 = vmax.f32 %v1739_v33, 0.0  ;;  %v2052_v22 = vadd.f32 %v2051_v35, %v2050_v34 }
 0x5f0   :  { %v1744_v38 = vadd.f32 %v2052_v22, %v1966_v15  ;;  %v2053_v39 = vpop.f32.mrb[12].mxu1  ;;  %1968 = vmatmul.mubr.msk.f32.vlgmr.msra.gmra.mrb[12].mxu0 %vm1779_vm6, %v1757_v36 }
 0x5f1   :  { %v2054_v7 = vpop.f32.mrb[13].mxu1  ;;  %1862 = vmatprep.mubr.f32.mxu0 %v2682_v2 }
 0x5f2   :  { %v1758_v40 = vmax.f32 %v1744_v38, 0.0  ;;  %v2055_v41 = vadd.f32 %v2054_v7, %v2053_v39  ;;  %v2622_v38 = vld [vmem:[%s3375_s0] sm:$0xff] }
 0x5f4   :  { %v1749_v42 = vadd.f32 %v2055_v41, %v1966_v15  ;;  %v2056_v43 = vpop.f32.mrb[14].mxu1  ;;  %1969 = vmatmul.mubr.msk.f32.gmra.mrb[14].mxu0 %vm1779_vm6, %v1758_v40  ;;  %v2623_v41 = vld [vmem:[%s3375_s0 + $0x8] sm:$0xff] }
 0x5f5   :  { %v2057_v45 = vpop.f32.mrb[15].mxu1  ;;  %1868 = vmatprep.mubr.f32.mxu0 %v2682_v2 }
 0x5f6   :  { %v1759_v46 = vmax.f32 %v1749_v42, 0.0  ;;  %v2058_v23 = vadd.f32 %v2057_v45, %v2056_v43  ;;  %v2624_v45 = vld [vmem:[%s3375_s0 + $0x10] sm:$0xff] }
 0x5f8   :  { %v1754_v50 = vadd.f32 %v2058_v23, %v1966_v15  ;;  %1970 = vmatmul.mubr.msk.f32.gmra.mrb[16].mxu0 %vm1779_vm6, %v1759_v46 }
 0x5fa   :  { %v1760_v3 = vmax.f32 %v1754_v50, 0.0  ;;  %v2625_v50 = vld [vmem:[%s3375_s0 + $0x18] sm:$0xff] }
 0x5fc   :  { %1971 = vmatmul.mubr.msk.f32.vlgmr.msra.gmra.mrb[16].mxu1 %vm1779_vm6, %v1760_v3 }
 0x6c3   :  { %v1858_v53 = vpop.f32.mrb[12].mxu0 }
 0x6c4   :  { %v1859_v54 = vadd.f32 %v1858_v53, %v1777_v51  ;;  %v1860_v47 = vpop.f32.mrb[13].mxu0  ;;  %v2626_v53 = vld [vmem:[%s3375_s0 + $0x20] sm:$0xff] }
 0x6c5   :  { %v1861_v56 = vadd.f32 %v1860_v47, %v1777_v51 }
 0x6c6   :  { %v1972_v27 = vmul.f32 -1.442695, %v1859_v54 }
 0x6c7   :  { %v1973_v52 = vmul.f32 -1.442695, %v1861_v56  ;;  %v1864_v13 = vpop.f32.mrb[14].mxu0  ;;  %v2627_v56 = vld [vmem:[%s3375_s0 + $0x28] sm:$0xff] }
 0x6c8   :  { %2582 = vpow2.f32 %v1972_v27  ;;  %v1865_v57 = vadd.f32 %v1864_v13, %v1777_v51  ;;  %v1866_v55 = vpop.f32.mrb[15].mxu0 }
 0x6c9   :  { %2584 = vpow2.f32 %v1973_v52  ;;  %v1867_v2 = vadd.f32 %v1866_v55, %v1777_v51  ;;  %v2628_v52 = vld [vmem:[%s3375_s0 + $0x30] sm:$0xff] }
 0x6ca   :  { %v1974_v58 = vmul.f32 -1.442695, %v1865_v57 }
 0x6cb   :  { %v1975_v59 = vmul.f32 -1.442695, %v1867_v2  ;;  %v1870_v4 = vpop.f32.mrb[16].mxu0 }
 0x6cc   :  { %2586 = vpow2.f32 %v1974_v58  ;;  %v1871_v61 = vadd.f32 %v1870_v4, %v1777_v51  ;;  %v1872_v1 = vpop.f32.mrb[17].mxu0 }
 0x6cd   :  { %2588 = vpow2.f32 %v1975_v59  ;;  %v1873_v10 = vadd.f32 %v1872_v1, %v1777_v51 }
 0x6ce   :  { %v1976_v63 = vmul.f32 -1.442695, %v1871_v61 }
 0x6cf   :  { %v1977_v28 = vmul.f32 -1.442695, %v1873_v10  ;;  %v1876_v12 = vpop.f32.mrb[16].mxu1 }
 0x6d0   :  { %2590 = vpow2.f32 %v1976_v63  ;;  %v1877_v49 = vadd.f32 %v1876_v12, %v1777_v51  ;;  %v1878_v37 = vpop.f32.mrb[17].mxu1 }
 0x6d1   :  { %2592 = vpow2.f32 %v1977_v28  ;;  %v1879_v17 = vadd.f32 %v1878_v37, %v1777_v51 }
 0x6d2   :  { %v2583_v21 = vpop.eup %2582  ;;  %v1978_v19 = vmul.f32 -1.442695, %v1877_v49 }
 0x6d3   :  { %v2585_v60 = vpop.eup %2584  ;;  %v1905_v20 = vadd.f32 1.0, %v2583_v21  ;;  %v1979_v44 = vmul.f32 -1.442695, %v1879_v17 }
 0x6d4   :  { %v1906_v24 = vadd.f32 1.0, %v2585_v60  ;;  %2594 = vpow2.f32 %v1978_v19 }
 0x6d5   :  { %2596 = vrcp.f32 %v1905_v20 }
 0x6d6   :  { %v2587_v18 = vpop.eup %2586  ;;  %2598 = vrcp.f32 %v1906_v24 }
 0x6d7   :  { %v2589_v5 = vpop.eup %2588  ;;  %v1907_v25 = vadd.f32 1.0, %v2587_v18  ;;  %2600 = vpow2.f32 %v1979_v44 }
 0x6d8   :  { %v1908_v26 = vadd.f32 1.0, %v2589_v5 }
 0x6d9   :  { %2602 = vrcp.f32 %v1907_v25 }
 0x6da   :  { %v2591_v29 = vpop.eup %2590  ;;  %2604 = vrcp.f32 %v1908_v26 }
 0x6db   :  { %v2593_v30 = vpop.eup %2592  ;;  %v1909_v31 = vadd.f32 1.0, %v2591_v29 }
 0x6dc   :  { %v1910_v15 = vadd.f32 1.0, %v2593_v30 }
 0x6dd   :  { %2606 = vrcp.f32 %v1909_v31 }
 0x6de   :  { %v2595_v16 = vpop.eup %2594  ;;  %2608 = vrcp.f32 %v1910_v15 }
 0x6df   :  { %v2597_v32 = vpop.eup %2596  ;;  %v1911_v33 = vadd.f32 1.0, %v2595_v16 }
 0x6e0   :  { %v2599_v34 = vpop.eup %2598  ;;  %v1929_v35 = vmul.f32 %v2597_v32, %v3255_v8 }
 0x6e1   :  { %v2601_v36 = vpop.eup %2600  ;;  %v1930_v22 = vmul.f32 %v2599_v34, %v3252_v48  ;;  %2610 = vrcp.f32 %v1911_v33 }
 0x6e2   :  { %v1937_v39 = vadd.f32 %v2622_v38, %v1929_v35  ;;  %v1912_v7 = vadd.f32 1.0, %v2601_v36 }
 0x6e3   :  { %v2603_v40 = vpop.eup %2602  ;;  %v1938_v42 = vadd.f32 %v2623_v41, %v1930_v22 }
 0x6e4   :  { %v2605_v43 = vpop.eup %2604  ;;  %1945 = vst [vmem:[%s3388_s13] sm:$0xff] %v1937_v39  ;;  %v1931_v48 = vmul.f32 %v2603_v40, %v3265_v14  ;;  %2612 = vrcp.f32 %v1912_v7 }
 0x6e5   :  { %1946 = vst [vmem:[%s3388_s13 + $0x8] sm:$0xff] %v1938_v42  ;;  %v1932_v8 = vmul.f32 %v2605_v43, %v3259_v9 }
 0x6e6   :  { %v1939_v46 = vadd.f32 %v2624_v45, %v1931_v48 }
 0x6e7   :  { %v2607_v23 = vpop.eup %2606  ;;  %v1940_v3 = vadd.f32 %v2625_v50, %v1932_v8 }
 0x6e8   :  { %v2609_v51 = vpop.eup %2608  ;;  %1947 = vst [vmem:[%s3388_s13 + $0x10] sm:$0xff] %v1939_v46  ;;  %v1933_v14 = vmul.f32 %v2607_v23, %v3274_v6 }
 0x6e9   :  { %1948 = vst [vmem:[%s3388_s13 + $0x18] sm:$0xff] %v1940_v3  ;;  %v1934_v9 = vmul.f32 %v2609_v51, %v3269_v11 }
 0x6ea   :  { %v1941_v54 = vadd.f32 %v2626_v53, %v1933_v14 }
 0x6eb   :  { %v2611_v47 = vpop.eup %2610  ;;  %v1942_v27 = vadd.f32 %v2627_v56, %v1934_v9 }
 0x6ec   :  { %1949 = vst [vmem:[%s3388_s13 + $0x20] sm:$0xff] %v1941_v54  ;;  %v1935_v6 = vmul.f32 %v2611_v47, %v3282_v62  ;;  %v2629_v62 = vld [vmem:[%s3375_s0 + $0x38] sm:$0xff] }
 0x6ed   :  { %1950 = vst [vmem:[%s3388_s13 + $0x28] sm:$0xff] %v1942_v27 }
 0x6ee   :  { %v2613_v11 = vpop.eup %2612  ;;  %v1943_v13 = vadd.f32 %v2628_v52, %v1935_v6 }
 0x6ef   :  { %v1936_v57 = vmul.f32 %v2613_v11, %v3277_v0 }
 0x6f0   :  { %1951 = vst [vmem:[%s3388_s13 + $0x30] sm:$0xff] %v1943_v13 }
 0x6f1   :  { %v1944_v55 = vadd.f32 %v2629_v62, %v1936_v57 }
 0x6f3   :  { %1952 = vst [vmem:[%s3388_s13 + $0x38] sm:$0xff] %v1944_v55 }
 0x6f4   :  { %1957 = vsyncpa [#allocation5], 1 }
 0x6f5   :  { %1958 = vsyncpa [#allocation7], 1 }

</bundles_post_ra>
